<compile_context>
chip_gen: v5e
topology: v5e:2x2
jax: 0.10.0
libtpu: 0.0.40
codegen_flags: <defaults>
</compile_context>

<pallas_src>
import jax
import jax.numpy as jnp
from jax import lax
from jax.experimental import pallas as pl
from jax.experimental.pallas import tpu as pltpu


# ---------------------------------------------------------------------------
# Fused kernel: all 3 branches of (zero_mean -> CorrelationBlock -> 1x1 convs)
# ---------------------------------------------------------------------------
def _make_stage1_kernel(nb, D, H, W, C, Co):
    HW = H * W
    n = D * HW  # elements per branch (for mean / unbiased std)

    def kernel(x_ref, ok_ref, w1ok_ref, b1_ref, w2bd_ref, w2rs_ref, b2_ref, o_ref):
        # One fused MXU matmul for every branch's conv2, on the RAW input
        # (zero_mean is applied afterwards as a cheap affine on the (3*Co, HW) result,
        #  so the matmul does not wait on any reduction).
        y2 = jnp.dot(w2bd_ref[...], x_ref[...],
                     preferred_element_type=jnp.float32)          # (nb*Co, HW)

        # One-hot row selector grp[c, p] = (p // W == c), built from iotas
        # (no integer division, no O(HW*W) constant matrices).  Branch independent.
        lane = lax.broadcasted_iota(jnp.int32, (C, HW), 1)
        rowW = lax.broadcasted_iota(jnp.int32, (C, HW), 0) * W
        grp = (lane >= rowW) & (lane < rowW + W)                  # bool (C, HW)

        for b in range(nb):
            xb = x_ref[b * D:(b + 1) * D, :]                      # (D, HW)

            # ---- zero_mean stats in a single pass (unbiased variance, N-1) ----
            cs = jnp.sum(xb, axis=0, keepdims=True)               # (1, HW) column sums
            mu = jnp.sum(cs) / n
            sumsq = jnp.sum(xb * xb)
            var = (sumsq - n * mu * mu) / (n - 1)
            inv_std = lax.rsqrt(var)

            # Column sums of the *normalized* features (affine fold of zero_mean).
            s_x = (cs - D * mu) * inv_std                         # (1, HW)

            # ---- corr path: rank-1 through conv1 (no MXU matmul, no corr tensor) ----
            w1ok_b = w1ok_ref[b * Co:(b + 1) * Co, :]             # (Co, 1) = w1 @ ok
            b1_b = b1_ref[b * Co:(b + 1) * Co, :]                 # (Co, 1)
            corr_conv = w1ok_b * s_x + b1_b                       # (Co, HW)

            # ---- ak path, entirely in the lane-expanded (C, HW) domain -------------
            # t[p] = sum_{q ≡ p (mod W)} s_x[q]   (== ak_base[w_img], lane-tiled)
            # computed with cyclic lane rolls (XLU) instead of a (HW, W) matmul.
            if (H & (H - 1)) == 0:                                # log2 fold
                t = s_x
                k = 1
                while k < H:
                    t = t + pltpu.roll(t, k * W, axis=1)
                    k *= 2
            else:                                                 # general fallback
                t = s_x
                for h in range(1, H):
                    t = t + pltpu.roll(s_x, h * W, axis=1)

            ok_b = ok_ref[b * C:(b + 1) * C, :]                   # (C, 1)
            # akE[c, p] = ak^T[c, p % W]  (each true ak value repeated H times along
            # lanes -> mean / per-row min / per-row max are unchanged).
            akE = ok_b * t                                        # (C, HW)
            avg = jnp.sum(akE) / akE.size                         # == torch.mean(ak)
            masked = jnp.where(akE > avg, akE, 0.0)               # strict >, like torch.gt
            # reference: .min(1)/.max(1) reduce over the Wimg (h_fk) axis == lane axis here
            masked = masked - jnp.min(masked, axis=1, keepdims=True)
            masked = masked / jnp.max(masked, axis=1, keepdims=True)   # exact division

            # scale[p] = masked[p // W, p]   (row-select via one-hot mask + sublane sum)
            scale = jnp.sum(jnp.where(grp, masked, 0.0), axis=0, keepdims=True)  # (1, HW)

            # ---- conv2 path: affine zero_mean correction + hoisted per-column scale ----
            y2_b = y2[b * Co:(b + 1) * Co, :]                     # (Co, HW) = w2 @ x
            w2rs_b = w2rs_ref[b * Co:(b + 1) * Co, :]             # (Co, 1) row sums of w2
            b2_b = b2_ref[b * Co:(b + 1) * Co, :]
            y2n = (y2_b - mu * w2rs_b) * inv_std                  # == w2 @ zero_mean(x)
            fk_conv = y2n * scale + b2_b                          # (Co, HW)

            # Co == 8 -> both slice stores are sublane-aligned, unmasked, lane-dense.
            o_ref[b * 2 * Co: b * 2 * Co + Co, :] = corr_conv
            o_ref[b * 2 * Co + Co: (b + 1) * 2 * Co, :] = fk_conv

    return kernel


# ---------------------------------------------------------------------------
# Host-side wrapper
# ---------------------------------------------------------------------------
def stage1_forward(params, image_features_256, image_features_512, image_features_1024):
    xs_in = (image_features_256, image_features_512, image_features_1024)
    B, D, H, W = xs_in[0].shape
    assert B == 1, "reference AttentionBlock permutes only make sense for B == 1"
    for x in xs_in:
        assert x.shape == xs_in[0].shape
    HW = H * W
    nb = 3

    # Free row-major reshape: NCHW -> stacked (3*D, H*W) lane-dense slab.
    xs = jnp.concatenate([x.reshape(D, HW) for x in xs_in], axis=0).astype(jnp.float32)

    ok_list = [params["o1"].reshape(-1, 1).astype(jnp.float32),
               params["o2"].reshape(-1, 1).astype(jnp.float32),
               params["o3"].reshape(-1, 1).astype(jnp.float32)]
    C = ok_list[0].shape[0]
    assert C == H, "ak.expand_as(fk) in the reference requires X*Y*Z == image H"
    oks = jnp.concatenate(ok_list, axis=0)                                      # (3C, 1)

    names = ("att256", "att512", "att1024")
    w1s = [params[n]["w1"].astype(jnp.float32) for n in names]                  # (Co, C)
    w2s = [params[n]["w2"].astype(jnp.float32) for n in names]                  # (Co, D)
    b1s = jnp.concatenate([params[n]["b1"] for n in names], axis=0).astype(jnp.float32)
    b2s = jnp.concatenate([params[n]["b2"] for n in names], axis=0).astype(jnp.float32)
    Co = w1s[0].shape[0]

    # corr is rank-1 in its channel axis -> fold conv1's weight with ok host-side.
    w1ok = jnp.concatenate([w1s[i] @ ok_list[i] for i in range(nb)], axis=0)    # (3Co, 1)

    # Block-diagonal conv2 weights: one MXU matmul covers all three branches.
    w2bd = jnp.zeros((nb * Co, nb * D), jnp.float32)
    for i, w in enumerate(w2s):
        w2bd = w2bd.at[i * Co:(i + 1) * Co, i * D:(i + 1) * D].set(w)
    # Row sums of w2 for the folded zero_mean affine correction.
    w2rs = jnp.concatenate([jnp.sum(w, axis=1, keepdims=True) for w in w2s], axis=0)

    kernel = _make_stage1_kernel(nb, D, H, W, C, Co)
    full = lambda i: (0, 0)
    out = pl.pallas_call(
        kernel,
        grid=(1,),
        in_specs=[
            pl.BlockSpec((nb * D, HW), full),
            pl.BlockSpec((nb * C, 1), full),
            pl.BlockSpec((nb * Co, 1), full),
            pl.BlockSpec((nb * Co, 1), full),
            pl.BlockSpec((nb * Co, nb * D), full),
            pl.BlockSpec((nb * Co, 1), full),
            pl.BlockSpec((nb * Co, 1), full),
        ],
        out_specs=pl.BlockSpec((nb * 2 * Co, HW), full),
        out_shape=jax.ShapeDtypeStruct((nb * 2 * Co, HW), jnp.float32),
        compiler_params=pltpu.CompilerParams(
            dimension_semantics=("arbitrary",),
            vmem_limit_bytes=32 * 1024 * 1024),
    )(xs, oks, w1ok, b1s, w2bd, w2rs, b2s)

    # Kernel columns are in image order (h_img*W + w_img); the reference output is
    # indexed (channel, w_img, h_img).  Tiny swap of the final lane-dense slab only.
    out = jnp.swapaxes(out.reshape(nb, 2 * Co, H, W), 2, 3)                     # (3, 2Co, W, H)

    # TODO(synk): remainder of Stage1.forward (self.resnet undefined, extractor /
    # resBlock are external modules, torch.cat called with two positional tensors,
    # out_merged_2 used before assignment -> conv1-3 / upsample_1-3 unreachable) is
    # broken in the reference and not translated.
    return out[0], out[1], out[2]


def init_params(key, *, D, X=2, Y=2, Z=4, Co=8):
    C = X * Y * Z  # correlation channel count; must equal spatial H of the input
    keys = jax.random.split(key, 9)

    def conv_p(k, co, ci):
        kw, kb = jax.random.split(k)
        return (0.1 * jax.random.normal(kw, (co, ci), jnp.float32),
                0.1 * jax.random.normal(kb, (co, 1), jnp.float32))

    params = {}
    for i, name in enumerate(("att256", "att512", "att1024")):
        w1, b1 = conv_p(keys[2 * i], Co, C)      # Conv2d(2880 -> 1440) analogue
        w2, b2 = conv_p(keys[2 * i + 1], Co, D)  # Conv2d(256  -> 1440) analogue
        params[name] = {"w1": w1, "b1": b1, "w2": w2, "b2": b2}
    params["o1"] = jax.random.normal(keys[6], (1, X, Y, Z), jnp.float32)
    params["o2"] = jax.random.normal(keys[7], (1, X, Y, Z), jnp.float32)
    params["o3"] = jax.random.normal(keys[8], (1, X, Y, Z), jnp.float32)
    return params


if __name__ == "__main__":
    key = jax.random.PRNGKey(0)
    k1, k2, k3, kp = jax.random.split(key, 4)

    # NCHW like the PyTorch reference: B=1, 32 feature channels, 16x16 spatial
    # (H*W = 256 -> lane-dense slabs inside the kernel, X*Y*Z = 16 == H).
    B, Cf, Hs, Ws = 1, 32, 16, 16
    x256 = jax.random.normal(k1, (B, Cf, Hs, Ws), jnp.float32)
    x512 = jax.random.normal(k2, (B, Cf, Hs, Ws), jnp.float32)
    x1024 = jax.random.normal(k3, (B, Cf, Hs, Ws), jnp.float32)

    params = init_params(kp, D=Cf, X=2, Y=2, Z=4, Co=8)

    fwd = jax.jit(stage1_forward)
    outs = fwd(params, x256, x512, x1024)
    jax.block_until_ready(outs)
    print("KERNEL_OK")
</pallas_src>

<mosaic_0001>
module attributes {stable_mosaic.version = 11 : i64} {
  func.func @kernel(%arg0: i32, %arg1: memref<96x256xf32, #tpu.memory_space<vmem>>, %arg2: memref<48x1xf32, #tpu.memory_space<vmem>>, %arg3: memref<24x1xf32, #tpu.memory_space<vmem>>, %arg4: memref<24x1xf32, #tpu.memory_space<vmem>>, %arg5: memref<24x96xf32, #tpu.memory_space<vmem>>, %arg6: memref<24x1xf32, #tpu.memory_space<vmem>>, %arg7: memref<24x1xf32, #tpu.memory_space<vmem>>, %arg8: memref<48x256xf32, #tpu.memory_space<vmem>>) attributes {dimension_semantics = [#tpu.dimension_semantics<arbitrary>], iteration_bounds = array<i64: 1>, scalar_prefetch = 0 : i64, scratch_operands = 0 : i64, tpu.core_type = #tpu.core_type<tc>, window_params = [{pipeline_mode = #tpu.pipeline_mode<synchronous>, transform_indices = @transform_0, window_bounds = array<i64: 96, 256>}, {pipeline_mode = #tpu.pipeline_mode<synchronous>, transform_indices = @transform_1, window_bounds = array<i64: 48, 1>}, {pipeline_mode = #tpu.pipeline_mode<synchronous>, transform_indices = @transform_2, window_bounds = array<i64: 24, 1>}, {pipeline_mode = #tpu.pipeline_mode<synchronous>, transform_indices = @transform_3, window_bounds = array<i64: 24, 1>}, {pipeline_mode = #tpu.pipeline_mode<synchronous>, transform_indices = @transform_4, window_bounds = array<i64: 24, 96>}, {pipeline_mode = #tpu.pipeline_mode<synchronous>, transform_indices = @transform_5, window_bounds = array<i64: 24, 1>}, {pipeline_mode = #tpu.pipeline_mode<synchronous>, transform_indices = @transform_6, window_bounds = array<i64: 24, 1>}, {pipeline_mode = #tpu.pipeline_mode<synchronous>, transform_indices = @transform_7, window_bounds = array<i64: 48, 256>}]} {
    %c0 = arith.constant 0 : index
    %c0_0 = arith.constant 0 : index
    %0 = vector.load %arg5[%c0, %c0_0] : memref<24x96xf32, #tpu.memory_space<vmem>>, vector<24x96xf32>
    %c0_1 = arith.constant 0 : index
    %c0_2 = arith.constant 0 : index
    %1 = vector.load %arg1[%c0_1, %c0_2] : memref<96x256xf32, #tpu.memory_space<vmem>>, vector<96x256xf32>
    %cst = arith.constant dense<0.000000e+00> : vector<24x256xf32>
    %2 = tpu.matmul %0, %1, %cst {dimension_numbers = #tpu.dot_dimension_numbers<[1], [0], [0], [1], [0, 0, 1, 1], [], []>} : vector<24x96xf32>, vector<96x256xf32>, vector<24x256xf32> -> vector<24x256xf32>
    %3 = tpu.iota {dimensions = array<i32: 1>} : vector<16x256xi32>
    %4 = tpu.iota {dimensions = array<i32: 0>} : vector<16x256xi32>
    %c16_i32 = arith.constant 16 : i32
    %5 = vector.broadcast %c16_i32 : i32 to vector<16x256xi32>
    %6 = arith.muli %4, %5 : vector<16x256xi32>
    %7 = arith.cmpi sge, %3, %6 : vector<16x256xi32>
    %c16_i32_3 = arith.constant 16 : i32
    %8 = vector.broadcast %c16_i32_3 : i32 to vector<16x256xi32>
    %9 = arith.addi %6, %8 : vector<16x256xi32>
    %10 = arith.cmpi slt, %3, %9 : vector<16x256xi32>
    %11 = arith.andi %7, %10 : vector<16x256xi1>
    %c0_4 = arith.constant 0 : index
    %c0_5 = arith.constant 0 : index
    %12 = vector.load %arg1[%c0_4, %c0_5] : memref<96x256xf32, #tpu.memory_space<vmem>>, vector<32x256xf32>
    %cst_6 = arith.constant dense<0.000000e+00> : vector<256xf32>
    %13 = vector.multi_reduction <add>, %12, %cst_6 [0] : vector<32x256xf32> to vector<256xf32>
    %14 = vector.shape_cast %13 : vector<256xf32> to vector<1x256xf32>
    %15 = vector.shape_cast %14 : vector<1x256xf32> to vector<1x1x256xf32>
    %cst_7 = arith.constant dense<0.000000e+00> : vector<1xf32>
    %16 = vector.multi_reduction <add>, %15, %cst_7 [1, 2] : vector<1x1x256xf32> to vector<1xf32>
    %17 = vector.shape_cast %16 : vector<1xf32> to vector<1x1x1xf32>
    %18 = vector.extract %17[0, 0, 0] : f32 from vector<1x1x1xf32>
    %cst_8 = arith.constant 8.192000e+03 : f32
    %19 = arith.divf %18, %cst_8 : f32
    %20 = arith.mulf %12, %12 : vector<32x256xf32>
    %21 = vector.shape_cast %20 : vector<32x256xf32> to vector<1x32x256xf32>
    %cst_9 = arith.constant dense<0.000000e+00> : vector<1xf32>
    %22 = vector.multi_reduction <add>, %21, %cst_9 [1, 2] : vector<1x32x256xf32> to vector<1xf32>
    %23 = vector.shape_cast %22 : vector<1xf32> to vector<1x1x1xf32>
    %24 = vector.extract %23[0, 0, 0] : f32 from vector<1x1x1xf32>
    %cst_10 = arith.constant 8.192000e+03 : f32
    %25 = arith.mulf %cst_10, %19 : f32
    %26 = arith.mulf %25, %19 : f32
    %27 = arith.subf %24, %26 : f32
    %cst_11 = arith.constant 8.191000e+03 : f32
    %28 = arith.divf %27, %cst_11 : f32
    %29 = math.rsqrt %28 : f32
    %cst_12 = arith.constant 3.200000e+01 : f32
    %30 = arith.mulf %cst_12, %19 : f32
    %31 = vector.broadcast %30 : f32 to vector<1x256xf32>
    %32 = arith.subf %14, %31 : vector<1x256xf32>
    %33 = vector.broadcast %29 : f32 to vector<1x256xf32>
    %34 = arith.mulf %32, %33 : vector<1x256xf32>
    %c0_13 = arith.constant 0 : index
    %c0_14 = arith.constant 0 : index
    %35 = vector.load %arg3[%c0_13, %c0_14] : memref<24x1xf32, #tpu.memory_space<vmem>>, vector<8x1xf32>
    %c0_15 = arith.constant 0 : index
    %c0_16 = arith.constant 0 : index
    %36 = vector.load %arg4[%c0_15, %c0_16] : memref<24x1xf32, #tpu.memory_space<vmem>>, vector<8x1xf32>
    %37 = vector.broadcast %35 : vector<8x1xf32> to vector<8x256xf32>
    %38 = vector.broadcast %34 : vector<1x256xf32> to vector<8x256xf32>
    %39 = arith.mulf %37, %38 : vector<8x256xf32>
    %40 = vector.broadcast %36 : vector<8x1xf32> to vector<8x256xf32>
    %41 = arith.addf %39, %40 : vector<8x256xf32>
    %c16_i32_17 = arith.constant 16 : i32
    %42 = tpu.dynamic_rotate %34 by %c16_i32_17 dim 1 : vector<1x256xf32>, i32 -> vector<1x256xf32>
    %43 = arith.addf %34, %42 : vector<1x256xf32>
    %c32_i32 = arith.constant 32 : i32
    %44 = tpu.dynamic_rotate %43 by %c32_i32 dim 1 : vector<1x256xf32>, i32 -> vector<1x256xf32>
    %45 = arith.addf %43, %44 : vector<1x256xf32>
    %c64_i32 = arith.constant 64 : i32
    %46 = tpu.dynamic_rotate %45 by %c64_i32 dim 1 : vector<1x256xf32>, i32 -> vector<1x256xf32>
    %47 = arith.addf %45, %46 : vector<1x256xf32>
    %c128_i32 = arith.constant 128 : i32
    %48 = tpu.dynamic_rotate %47 by %c128_i32 dim 1 : vector<1x256xf32>, i32 -> vector<1x256xf32>
    %49 = arith.addf %47, %48 : vector<1x256xf32>
    %c0_18 = arith.constant 0 : index
    %c0_19 = arith.constant 0 : index
    %50 = vector.load %arg2[%c0_18, %c0_19] : memref<48x1xf32, #tpu.memory_space<vmem>>, vector<16x1xf32>
    %51 = vector.broadcast %50 : vector<16x1xf32> to vector<16x256xf32>
    %52 = vector.broadcast %49 : vector<1x256xf32> to vector<16x256xf32>
    %53 = arith.mulf %51, %52 : vector<16x256xf32>
    %54 = vector.shape_cast %53 : vector<16x256xf32> to vector<1x16x256xf32>
    %cst_20 = arith.constant dense<0.000000e+00> : vector<1xf32>
    %55 = vector.multi_reduction <add>, %54, %cst_20 [1, 2] : vector<1x16x256xf32> to vector<1xf32>
    %56 = vector.shape_cast %55 : vector<1xf32> to vector<1x1x1xf32>
    %57 = vector.extract %56[0, 0, 0] : f32 from vector<1x1x1xf32>
    %cst_21 = arith.constant 4.096000e+03 : f32
    %58 = arith.divf %57, %cst_21 : f32
    %59 = vector.broadcast %58 : f32 to vector<16x256xf32>
    %60 = arith.cmpf ogt, %53, %59 : vector<16x256xf32>
    %cst_22 = arith.constant 0.000000e+00 : f32
    %61 = vector.broadcast %cst_22 : f32 to vector<16x256xf32>
    %62 = arith.select %60, %53, %61 : vector<16x256xi1>, vector<16x256xf32>
    %cst_23 = arith.constant dense<0x7F800000> : vector<16xf32>
    %63 = vector.multi_reduction <minimumf>, %62, %cst_23 [1] : vector<16x256xf32> to vector<16xf32>
    %64 = vector.shape_cast %63 : vector<16xf32> to vector<16x1xf32>
    %65 = vector.broadcast %64 : vector<16x1xf32> to vector<16x256xf32>
    %66 = arith.subf %62, %65 : vector<16x256xf32>
    %cst_24 = arith.constant dense<0xFF800000> : vector<16xf32>
    %67 = vector.multi_reduction <maximumf>, %66, %cst_24 [1] : vector<16x256xf32> to vector<16xf32>
    %68 = vector.shape_cast %67 : vector<16xf32> to vector<16x1xf32>
    %69 = vector.broadcast %68 : vector<16x1xf32> to vector<16x256xf32>
    %70 = arith.divf %66, %69 : vector<16x256xf32>
    %cst_25 = arith.constant 0.000000e+00 : f32
    %71 = vector.broadcast %cst_25 : f32 to vector<16x256xf32>
    %72 = arith.select %11, %70, %71 : vector<16x256xi1>, vector<16x256xf32>
    %cst_26 = arith.constant dense<0.000000e+00> : vector<256xf32>
    %73 = vector.multi_reduction <add>, %72, %cst_26 [0] : vector<16x256xf32> to vector<256xf32>
    %74 = vector.shape_cast %73 : vector<256xf32> to vector<1x256xf32>
    %75 = vector.extract_strided_slice %2 {offsets = [0, 0], sizes = [8, 256], strides = [1, 1]} : vector<24x256xf32> to vector<8x256xf32>
    %c0_27 = arith.constant 0 : index
    %c0_28 = arith.constant 0 : index
    %76 = vector.load %arg6[%c0_27, %c0_28] : memref<24x1xf32, #tpu.memory_space<vmem>>, vector<8x1xf32>
    %c0_29 = arith.constant 0 : index
    %c0_30 = arith.constant 0 : index
    %77 = vector.load %arg7[%c0_29, %c0_30] : memref<24x1xf32, #tpu.memory_space<vmem>>, vector<8x1xf32>
    %78 = vector.broadcast %19 : f32 to vector<8x1xf32>
    %79 = arith.mulf %78, %76 : vector<8x1xf32>
    %80 = vector.broadcast %79 : vector<8x1xf32> to vector<8x256xf32>
    %81 = arith.subf %75, %80 : vector<8x256xf32>
    %82 = vector.broadcast %29 : f32 to vector<8x256xf32>
    %83 = arith.mulf %81, %82 : vector<8x256xf32>
    %84 = vector.broadcast %74 : vector<1x256xf32> to vector<8x256xf32>
    %85 = arith.mulf %83, %84 : vector<8x256xf32>
    %86 = vector.broadcast %77 : vector<8x1xf32> to vector<8x256xf32>
    %87 = arith.addf %85, %86 : vector<8x256xf32>
    %c0_31 = arith.constant 0 : index
    %c0_32 = arith.constant 0 : index
    %88 = vector.load %arg8[%c0_31, %c0_32] : memref<48x256xf32, #tpu.memory_space<vmem>>, vector<8x256xf32>
    tpu.vector_store %arg8[%c0_31, %c0_32], %41 {strides = array<i32>} : memref<48x256xf32, #tpu.memory_space<vmem>>, vector<8x256xf32>,
    %c8 = arith.constant 8 : index
    %c0_33 = arith.constant 0 : index
    %89 = vector.load %arg8[%c8, %c0_33] : memref<48x256xf32, #tpu.memory_space<vmem>>, vector<8x256xf32>
    tpu.vector_store %arg8[%c8, %c0_33], %87 {strides = array<i32>} : memref<48x256xf32, #tpu.memory_space<vmem>>, vector<8x256xf32>,
    %c32 = arith.constant 32 : index
    %c0_34 = arith.constant 0 : index
    %90 = vector.load %arg1[%c32, %c0_34] : memref<96x256xf32, #tpu.memory_space<vmem>>, vector<32x256xf32>
    %cst_35 = arith.constant dense<0.000000e+00> : vector<256xf32>
    %91 = vector.multi_reduction <add>, %90, %cst_35 [0] : vector<32x256xf32> to vector<256xf32>
    %92 = vector.shape_cast %91 : vector<256xf32> to vector<1x256xf32>
    %93 = vector.shape_cast %92 : vector<1x256xf32> to vector<1x1x256xf32>
    %cst_36 = arith.constant dense<0.000000e+00> : vector<1xf32>
    %94 = vector.multi_reduction <add>, %93, %cst_36 [1, 2] : vector<1x1x256xf32> to vector<1xf32>
    %95 = vector.shape_cast %94 : vector<1xf32> to vector<1x1x1xf32>
    %96 = vector.extract %95[0, 0, 0] : f32 from vector<1x1x1xf32>
    %cst_37 = arith.constant 8.192000e+03 : f32
    %97 = arith.divf %96, %cst_37 : f32
    %98 = arith.mulf %90, %90 : vector<32x256xf32>
    %99 = vector.shape_cast %98 : vector<32x256xf32> to vector<1x32x256xf32>
    %cst_38 = arith.constant dense<0.000000e+00> : vector<1xf32>
    %100 = vector.multi_reduction <add>, %99, %cst_38 [1, 2] : vector<1x32x256xf32> to vector<1xf32>
    %101 = vector.shape_cast %100 : vector<1xf32> to vector<1x1x1xf32>
    %102 = vector.extract %101[0, 0, 0] : f32 from vector<1x1x1xf32>
    %cst_39 = arith.constant 8.192000e+03 : f32
    %103 = arith.mulf %cst_39, %97 : f32
    %104 = arith.mulf %103, %97 : f32
    %105 = arith.subf %102, %104 : f32
    %cst_40 = arith.constant 8.191000e+03 : f32
    %106 = arith.divf %105, %cst_40 : f32
    %107 = math.rsqrt %106 : f32
    %cst_41 = arith.constant 3.200000e+01 : f32
    %108 = arith.mulf %cst_41, %97 : f32
    %109 = vector.broadcast %108 : f32 to vector<1x256xf32>
    %110 = arith.subf %92, %109 : vector<1x256xf32>
    %111 = vector.broadcast %107 : f32 to vector<1x256xf32>
    %112 = arith.mulf %110, %111 : vector<1x256xf32>
    %c8_42 = arith.constant 8 : index
    %c0_43 = arith.constant 0 : index
    %113 = vector.load %arg3[%c8_42, %c0_43] : memref<24x1xf32, #tpu.memory_space<vmem>>, vector<8x1xf32>
    %c8_44 = arith.constant 8 : index
    %c0_45 = arith.constant 0 : index
    %114 = vector.load %arg4[%c8_44, %c0_45] : memref<24x1xf32, #tpu.memory_space<vmem>>, vector<8x1xf32>
    %115 = vector.broadcast %113 : vector<8x1xf32> to vector<8x256xf32>
    %116 = vector.broadcast %112 : vector<1x256xf32> to vector<8x256xf32>
    %117 = arith.mulf %115, %116 : vector<8x256xf32>
    %118 = vector.broadcast %114 : vector<8x1xf32> to vector<8x256xf32>
    %119 = arith.addf %117, %118 : vector<8x256xf32>
    %c16_i32_46 = arith.constant 16 : i32
    %120 = tpu.dynamic_rotate %112 by %c16_i32_46 dim 1 : vector<1x256xf32>, i32 -> vector<1x256xf32>
    %121 = arith.addf %112, %120 : vector<1x256xf32>
    %c32_i32_47 = arith.constant 32 : i32
    %122 = tpu.dynamic_rotate %121 by %c32_i32_47 dim 1 : vector<1x256xf32>, i32 -> vector<1x256xf32>
    %123 = arith.addf %121, %122 : vector<1x256xf32>
    %c64_i32_48 = arith.constant 64 : i32
    %124 = tpu.dynamic_rotate %123 by %c64_i32_48 dim 1 : vector<1x256xf32>, i32 -> vector<1x256xf32>
    %125 = arith.addf %123, %124 : vector<1x256xf32>
    %c128_i32_49 = arith.constant 128 : i32
    %126 = tpu.dynamic_rotate %125 by %c128_i32_49 dim 1 : vector<1x256xf32>, i32 -> vector<1x256xf32>
    %127 = arith.addf %125, %126 : vector<1x256xf32>
    %c16 = arith.constant 16 : index
    %c0_50 = arith.constant 0 : index
    %128 = vector.load %arg2[%c16, %c0_50] : memref<48x1xf32, #tpu.memory_space<vmem>>, vector<16x1xf32>
    %129 = vector.broadcast %128 : vector<16x1xf32> to vector<16x256xf32>
    %130 = vector.broadcast %127 : vector<1x256xf32> to vector<16x256xf32>
    %131 = arith.mulf %129, %130 : vector<16x256xf32>
    %132 = vector.shape_cast %131 : vector<16x256xf32> to vector<1x16x256xf32>
    %cst_51 = arith.constant dense<0.000000e+00> : vector<1xf32>
    %133 = vector.multi_reduction <add>, %132, %cst_51 [1, 2] : vector<1x16x256xf32> to vector<1xf32>
    %134 = vector.shape_cast %133 : vector<1xf32> to vector<1x1x1xf32>
    %135 = vector.extract %134[0, 0, 0] : f32 from vector<1x1x1xf32>
    %cst_52 = arith.constant 4.096000e+03 : f32
    %136 = arith.divf %135, %cst_52 : f32
    %137 = vector.broadcast %136 : f32 to vector<16x256xf32>
    %138 = arith.cmpf ogt, %131, %137 : vector<16x256xf32>
    %cst_53 = arith.constant 0.000000e+00 : f32
    %139 = vector.broadcast %cst_53 : f32 to vector<16x256xf32>
    %140 = arith.select %138, %131, %139 : vector<16x256xi1>, vector<16x256xf32>
    %cst_54 = arith.constant dense<0x7F800000> : vector<16xf32>
    %141 = vector.multi_reduction <minimumf>, %140, %cst_54 [1] : vector<16x256xf32> to vector<16xf32>
    %142 = vector.shape_cast %141 : vector<16xf32> to vector<16x1xf32>
    %143 = vector.broadcast %142 : vector<16x1xf32> to vector<16x256xf32>
    %144 = arith.subf %140, %143 : vector<16x256xf32>
    %cst_55 = arith.constant dense<0xFF800000> : vector<16xf32>
    %145 = vector.multi_reduction <maximumf>, %144, %cst_55 [1] : vector<16x256xf32> to vector<16xf32>
    %146 = vector.shape_cast %145 : vector<16xf32> to vector<16x1xf32>
    %147 = vector.broadcast %146 : vector<16x1xf32> to vector<16x256xf32>
    %148 = arith.divf %144, %147 : vector<16x256xf32>
    %cst_56 = arith.constant 0.000000e+00 : f32
    %149 = vector.broadcast %cst_56 : f32 to vector<16x256xf32>
    %150 = arith.select %11, %148, %149 : vector<16x256xi1>, vector<16x256xf32>
    %cst_57 = arith.constant dense<0.000000e+00> : vector<256xf32>
    %151 = vector.multi_reduction <add>, %150, %cst_57 [0] : vector<16x256xf32> to vector<256xf32>
    %152 = vector.shape_cast %151 : vector<256xf32> to vector<1x256xf32>
    %153 = vector.extract_strided_slice %2 {offsets = [8, 0], sizes = [8, 256], strides = [1, 1]} : vector<24x256xf32> to vector<8x256xf32>
    %c8_58 = arith.constant 8 : index
    %c0_59 = arith.constant 0 : index
    %154 = vector.load %arg6[%c8_58, %c0_59] : memref<24x1xf32, #tpu.memory_space<vmem>>, vector<8x1xf32>
    %c8_60 = arith.constant 8 : index
    %c0_61 = arith.constant 0 : index
    %155 = vector.load %arg7[%c8_60, %c0_61] : memref<24x1xf32, #tpu.memory_space<vmem>>, vector<8x1xf32>
    %156 = vector.broadcast %97 : f32 to vector<8x1xf32>
    %157 = arith.mulf %156, %154 : vector<8x1xf32>
    %158 = vector.broadcast %157 : vector<8x1xf32> to vector<8x256xf32>
    %159 = arith.subf %153, %158 : vector<8x256xf32>
    %160 = vector.broadcast %107 : f32 to vector<8x256xf32>
    %161 = arith.mulf %159, %160 : vector<8x256xf32>
    %162 = vector.broadcast %152 : vector<1x256xf32> to vector<8x256xf32>
    %163 = arith.mulf %161, %162 : vector<8x256xf32>
    %164 = vector.broadcast %155 : vector<8x1xf32> to vector<8x256xf32>
    %165 = arith.addf %163, %164 : vector<8x256xf32>
    %c16_62 = arith.constant 16 : index
    %c0_63 = arith.constant 0 : index
    %166 = vector.load %arg8[%c16_62, %c0_63] : memref<48x256xf32, #tpu.memory_space<vmem>>, vector<8x256xf32>
    tpu.vector_store %arg8[%c16_62, %c0_63], %119 {strides = array<i32>} : memref<48x256xf32, #tpu.memory_space<vmem>>, vector<8x256xf32>,
    %c24 = arith.constant 24 : index
    %c0_64 = arith.constant 0 : index
    %167 = vector.load %arg8[%c24, %c0_64] : memref<48x256xf32, #tpu.memory_space<vmem>>, vector<8x256xf32>
    tpu.vector_store %arg8[%c24, %c0_64], %165 {strides = array<i32>} : memref<48x256xf32, #tpu.memory_space<vmem>>, vector<8x256xf32>,
    %c64 = arith.constant 64 : index
    %c0_65 = arith.constant 0 : index
    %168 = vector.load %arg1[%c64, %c0_65] : memref<96x256xf32, #tpu.memory_space<vmem>>, vector<32x256xf32>
    %cst_66 = arith.constant dense<0.000000e+00> : vector<256xf32>
    %169 = vector.multi_reduction <add>, %168, %cst_66 [0] : vector<32x256xf32> to vector<256xf32>
    %170 = vector.shape_cast %169 : vector<256xf32> to vector<1x256xf32>
    %171 = vector.shape_cast %170 : vector<1x256xf32> to vector<1x1x256xf32>
    %cst_67 = arith.constant dense<0.000000e+00> : vector<1xf32>
    %172 = vector.multi_reduction <add>, %171, %cst_67 [1, 2] : vector<1x1x256xf32> to vector<1xf32>
    %173 = vector.shape_cast %172 : vector<1xf32> to vector<1x1x1xf32>
    %174 = vector.extract %173[0, 0, 0] : f32 from vector<1x1x1xf32>
    %cst_68 = arith.constant 8.192000e+03 : f32
    %175 = arith.divf %174, %cst_68 : f32
    %176 = arith.mulf %168, %168 : vector<32x256xf32>
    %177 = vector.shape_cast %176 : vector<32x256xf32> to vector<1x32x256xf32>
    %cst_69 = arith.constant dense<0.000000e+00> : vector<1xf32>
    %178 = vector.multi_reduction <add>, %177, %cst_69 [1, 2] : vector<1x32x256xf32> to vector<1xf32>
    %179 = vector.shape_cast %178 : vector<1xf32> to vector<1x1x1xf32>
    %180 = vector.extract %179[0, 0, 0] : f32 from vector<1x1x1xf32>
    %cst_70 = arith.constant 8.192000e+03 : f32
    %181 = arith.mulf %cst_70, %175 : f32
    %182 = arith.mulf %181, %175 : f32
    %183 = arith.subf %180, %182 : f32
    %cst_71 = arith.constant 8.191000e+03 : f32
    %184 = arith.divf %183, %cst_71 : f32
    %185 = math.rsqrt %184 : f32
    %cst_72 = arith.constant 3.200000e+01 : f32
    %186 = arith.mulf %cst_72, %175 : f32
    %187 = vector.broadcast %186 : f32 to vector<1x256xf32>
    %188 = arith.subf %170, %187 : vector<1x256xf32>
    %189 = vector.broadcast %185 : f32 to vector<1x256xf32>
    %190 = arith.mulf %188, %189 : vector<1x256xf32>
    %c16_73 = arith.constant 16 : index
    %c0_74 = arith.constant 0 : index
    %191 = vector.load %arg3[%c16_73, %c0_74] : memref<24x1xf32, #tpu.memory_space<vmem>>, vector<8x1xf32>
    %c16_75 = arith.constant 16 : index
    %c0_76 = arith.constant 0 : index
    %192 = vector.load %arg4[%c16_75, %c0_76] : memref<24x1xf32, #tpu.memory_space<vmem>>, vector<8x1xf32>
    %193 = vector.broadcast %191 : vector<8x1xf32> to vector<8x256xf32>
    %194 = vector.broadcast %190 : vector<1x256xf32> to vector<8x256xf32>
    %195 = arith.mulf %193, %194 : vector<8x256xf32>
    %196 = vector.broadcast %192 : vector<8x1xf32> to vector<8x256xf32>
    %197 = arith.addf %195, %196 : vector<8x256xf32>
    %c16_i32_77 = arith.constant 16 : i32
    %198 = tpu.dynamic_rotate %190 by %c16_i32_77 dim 1 : vector<1x256xf32>, i32 -> vector<1x256xf32>
    %199 = arith.addf %190, %198 : vector<1x256xf32>
    %c32_i32_78 = arith.constant 32 : i32
    %200 = tpu.dynamic_rotate %199 by %c32_i32_78 dim 1 : vector<1x256xf32>, i32 -> vector<1x256xf32>
    %201 = arith.addf %199, %200 : vector<1x256xf32>
    %c64_i32_79 = arith.constant 64 : i32
    %202 = tpu.dynamic_rotate %201 by %c64_i32_79 dim 1 : vector<1x256xf32>, i32 -> vector<1x256xf32>
    %203 = arith.addf %201, %202 : vector<1x256xf32>
    %c128_i32_80 = arith.constant 128 : i32
    %204 = tpu.dynamic_rotate %203 by %c128_i32_80 dim 1 : vector<1x256xf32>, i32 -> vector<1x256xf32>
    %205 = arith.addf %203, %204 : vector<1x256xf32>
    %c32_81 = arith.constant 32 : index
    %c0_82 = arith.constant 0 : index
    %206 = vector.load %arg2[%c32_81, %c0_82] : memref<48x1xf32, #tpu.memory_space<vmem>>, vector<16x1xf32>
    %207 = vector.broadcast %206 : vector<16x1xf32> to vector<16x256xf32>
    %208 = vector.broadcast %205 : vector<1x256xf32> to vector<16x256xf32>
    %209 = arith.mulf %207, %208 : vector<16x256xf32>
    %210 = vector.shape_cast %209 : vector<16x256xf32> to vector<1x16x256xf32>
    %cst_83 = arith.constant dense<0.000000e+00> : vector<1xf32>
    %211 = vector.multi_reduction <add>, %210, %cst_83 [1, 2] : vector<1x16x256xf32> to vector<1xf32>
    %212 = vector.shape_cast %211 : vector<1xf32> to vector<1x1x1xf32>
    %213 = vector.extract %212[0, 0, 0] : f32 from vector<1x1x1xf32>
    %cst_84 = arith.constant 4.096000e+03 : f32
    %214 = arith.divf %213, %cst_84 : f32
    %215 = vector.broadcast %214 : f32 to vector<16x256xf32>
    %216 = arith.cmpf ogt, %209, %215 : vector<16x256xf32>
    %cst_85 = arith.constant 0.000000e+00 : f32
    %217 = vector.broadcast %cst_85 : f32 to vector<16x256xf32>
    %218 = arith.select %216, %209, %217 : vector<16x256xi1>, vector<16x256xf32>
    %cst_86 = arith.constant dense<0x7F800000> : vector<16xf32>
    %219 = vector.multi_reduction <minimumf>, %218, %cst_86 [1] : vector<16x256xf32> to vector<16xf32>
    %220 = vector.shape_cast %219 : vector<16xf32> to vector<16x1xf32>
    %221 = vector.broadcast %220 : vector<16x1xf32> to vector<16x256xf32>
    %222 = arith.subf %218, %221 : vector<16x256xf32>
    %cst_87 = arith.constant dense<0xFF800000> : vector<16xf32>
    %223 = vector.multi_reduction <maximumf>, %222, %cst_87 [1] : vector<16x256xf32> to vector<16xf32>
    %224 = vector.shape_cast %223 : vector<16xf32> to vector<16x1xf32>
    %225 = vector.broadcast %224 : vector<16x1xf32> to vector<16x256xf32>
    %226 = arith.divf %222, %225 : vector<16x256xf32>
    %cst_88 = arith.constant 0.000000e+00 : f32
    %227 = vector.broadcast %cst_88 : f32 to vector<16x256xf32>
    %228 = arith.select %11, %226, %227 : vector<16x256xi1>, vector<16x256xf32>
    %cst_89 = arith.constant dense<0.000000e+00> : vector<256xf32>
    %229 = vector.multi_reduction <add>, %228, %cst_89 [0] : vector<16x256xf32> to vector<256xf32>
    %230 = vector.shape_cast %229 : vector<256xf32> to vector<1x256xf32>
    %231 = vector.extract_strided_slice %2 {offsets = [16, 0], sizes = [8, 256], strides = [1, 1]} : vector<24x256xf32> to vector<8x256xf32>
    %c16_90 = arith.constant 16 : index
    %c0_91 = arith.constant 0 : index
    %232 = vector.load %arg6[%c16_90, %c0_91] : memref<24x1xf32, #tpu.memory_space<vmem>>, vector<8x1xf32>
    %c16_92 = arith.constant 16 : index
    %c0_93 = arith.constant 0 : index
    %233 = vector.load %arg7[%c16_92, %c0_93] : memref<24x1xf32, #tpu.memory_space<vmem>>, vector<8x1xf32>
    %234 = vector.broadcast %175 : f32 to vector<8x1xf32>
    %235 = arith.mulf %234, %232 : vector<8x1xf32>
    %236 = vector.broadcast %235 : vector<8x1xf32> to vector<8x256xf32>
    %237 = arith.subf %231, %236 : vector<8x256xf32>
    %238 = vector.broadcast %185 : f32 to vector<8x256xf32>
    %239 = arith.mulf %237, %238 : vector<8x256xf32>
    %240 = vector.broadcast %230 : vector<1x256xf32> to vector<8x256xf32>
    %241 = arith.mulf %239, %240 : vector<8x256xf32>
    %242 = vector.broadcast %233 : vector<8x1xf32> to vector<8x256xf32>
    %243 = arith.addf %241, %242 : vector<8x256xf32>
    %c32_94 = arith.constant 32 : index
    %c0_95 = arith.constant 0 : index
    %244 = vector.load %arg8[%c32_94, %c0_95] : memref<48x256xf32, #tpu.memory_space<vmem>>, vector<8x256xf32>
    tpu.vector_store %arg8[%c32_94, %c0_95], %197 {strides = array<i32>} : memref<48x256xf32, #tpu.memory_space<vmem>>, vector<8x256xf32>,
    %c40 = arith.constant 40 : index
    %c0_96 = arith.constant 0 : index
    %245 = vector.load %arg8[%c40, %c0_96] : memref<48x256xf32, #tpu.memory_space<vmem>>, vector<8x256xf32>
    tpu.vector_store %arg8[%c40, %c0_96], %243 {strides = array<i32>} : memref<48x256xf32, #tpu.memory_space<vmem>>, vector<8x256xf32>,
    return
  }
  func.func @transform_0(%arg0: i32) -> (i32, i32) {
    %c0_i32 = arith.constant 0 : i32
    %c0_i32_0 = arith.constant 0 : i32
    %c0_i32_1 = arith.constant 0 : i32
    return %c0_i32, %c0_i32_0 : i32, i32
  }
  func.func @transform_1(%arg0: i32) -> (i32, i32) {
    %c0_i32 = arith.constant 0 : i32
    %c0_i32_0 = arith.constant 0 : i32
    %c0_i32_1 = arith.constant 0 : i32
    return %c0_i32, %c0_i32_0 : i32, i32
  }
  func.func @transform_2(%arg0: i32) -> (i32, i32) {
    %c0_i32 = arith.constant 0 : i32
    %c0_i32_0 = arith.constant 0 : i32
    %c0_i32_1 = arith.constant 0 : i32
    return %c0_i32, %c0_i32_0 : i32, i32
  }
  func.func @transform_3(%arg0: i32) -> (i32, i32) {
    %c0_i32 = arith.constant 0 : i32
    %c0_i32_0 = arith.constant 0 : i32
    %c0_i32_1 = arith.constant 0 : i32
    return %c0_i32, %c0_i32_0 : i32, i32
  }
  func.func @transform_4(%arg0: i32) -> (i32, i32) {
    %c0_i32 = arith.constant 0 : i32
    %c0_i32_0 = arith.constant 0 : i32
    %c0_i32_1 = arith.constant 0 : i32
    return %c0_i32, %c0_i32_0 : i32, i32
  }
  func.func @transform_5(%arg0: i32) -> (i32, i32) {
    %c0_i32 = arith.constant 0 : i32
    %c0_i32_0 = arith.constant 0 : i32
    %c0_i32_1 = arith.constant 0 : i32
    return %c0_i32, %c0_i32_0 : i32, i32
  }
  func.func @transform_6(%arg0: i32) -> (i32, i32) {
    %c0_i32 = arith.constant 0 : i32
    %c0_i32_0 = arith.constant 0 : i32
    %c0_i32_1 = arith.constant 0 : i32
    return %c0_i32, %c0_i32_0 : i32, i32
  }
  func.func @transform_7(%arg0: i32) -> (i32, i32) {
    %c0_i32 = arith.constant 0 : i32
    %c0_i32_0 = arith.constant 0 : i32
    %c0_i32_1 = arith.constant 0 : i32
    return %c0_i32, %c0_i32_0 : i32, i32
  }
}

</mosaic_0001>

<bundles_post_ra>
// kernel: stage1_forward.1
= control target key start
LH: loop header
LB: loop body
LE: loop exit
PB: predicated region body
PF: predicated region fallthrough
CT: control target
= control target key end

     0   :  { %vm163_vm0 = vcmask 1040384   ;;  %v1043_v44 = vmov 8192.0   ;;  %v1044_v46 = vmov 8191.0   ;;  %s1045_s28 = smov 16   ;;  %s1046_s29 = smov 32   ;;  %s1676_s0 = inlined_call_operand.vmem [shape: f32[96,256], index: 0, kind: input, shape index: {}]   ;;  %s1677_s1 = inlined_call_operand.vmem [shape: f32[48,1], index: 1, kind: input, shape index: {}]   ;;  %s1678_s3 = inlined_call_operand.vmem [shape: f32[24,1], index: 3, kind: input, shape index: {}]   ;;  %s1679_s4 = inlined_call_operand.vmem [shape: f32[24,96], index: 4, kind: input, shape index: {}]   ;;  %s1680_s2 = inlined_call_operand.vmem [shape: f32[24,1], index: 2, kind: input, shape index: {}]   ;;  %s1681_s5 = inlined_call_operand.vmem [shape: f32[24,1], index: 5, kind: input, shape index: {}]   ;;  %s1682_s6 = inlined_call_operand.vmem [shape: f32[24,1], index: 6, kind: input, shape index: {}]   ;;  %s1683_s7 = inlined_call_operand.vmem [shape: f32[48,256], index: 7, kind: output, shape index: {}]  }
   0x1   :  { %v137_v0 = vld [vmem:[%s1676_s0] sm:$0xff]  ;;  %v138_v1 = vld [vmem:[%s1676_s0 + $0x8] sm:$0xff]  ;;  %v139_v2 = vld [vmem:[%s1676_s0 + $0x10] sm:$0xff]  ;;  %1019 = vrcp.f32 %v1043_v44  ;;  %s1048_s9 = smov 64  }
   0x2   :  { %v140_v3 = vld [vmem:[%s1676_s0 + $0x18] sm:$0xff]  ;;  %v141_v4 = vld [vmem:[%s1676_s0 + $0x20] sm:$0xff]  ;;  %v142_v5 = vld [vmem:[%s1676_s0 + $0x28] sm:$0xff]  ;;  %v145_v6 = vadd.f32 %v139_v2, %v137_v0  ;;  %v185_v7 = vmul.f32 %v137_v0, %v137_v0  ;;  %v186_v8 = vmul.f32 %v138_v1, %v138_v1  ;;  %v187_v13 = vmul.f32 %v139_v2, %v139_v2 }
   0x3   :  { %v143_v9 = vld [vmem:[%s1676_s0 + $0x30] sm:$0xff]  ;;  %v154_v10 = vadd.f32 %v140_v3, %v138_v1  ;;  %v144_v11 = vld [vmem:[%s1676_s0 + $0x38] sm:$0xff]  ;;  %v188_v19 = vmul.f32 %v140_v3, %v140_v3  ;;  %v189_v25 = vmul.f32 %v141_v4, %v141_v4  ;;  %v190_v31 = vmul.f32 %v142_v5, %v142_v5  ;;  %v1197_v44 = vld [vmem:[%s1676_s0 + $0x60] sm:$0xff] }
   0x4   :  { %v146_v12 = vadd.f32 %v145_v6, %v141_v4  ;;  %v193_v14 = vadd.f32 %v186_v8, %v185_v7  ;;  %v191_v37 = vmul.f32 %v143_v9, %v143_v9  ;;  %v192_v41 = vmul.f32 %v144_v11, %v144_v11 }
   0x5   :  { %v155_v15 = vadd.f32 %v154_v10, %v142_v5  ;;  %1021 = vrcp.f32 %v1044_v46 }
   0x6   :  { %v147_v16 = vadd.f32 %v146_v12, %v143_v9  ;;  %v194_v20 = vadd.f32 %v193_v14, %v187_v13 }
   0x7   :  { %v156_v17 = vadd.f32 %v155_v15, %v144_v11  ;;  %v1020_v45 = vpop.eup %1019 }
   0x8   :  { %v148_v18 = vrot.slane %v147_v16, 4  ;;  %v195_v26 = vadd.f32 %v194_v20, %v188_v19  ;;  %v177_v47 = vmul.f32 8192.0, %v1020_v45  ;;  %vm181_vm1 = vweird.f32 %v1020_v45 }
   0x9   :  { %v157_v21 = vrot.slane %v156_v17, 4 }
   0xa   :  { %v149_v22 = vadd.f32 %v148_v18, %v147_v16  ;;  %v196_v32 = vadd.f32 %v195_v26, %v189_v25  ;;  %v178_v48 = vsub.f32 1.0, %v177_v47 }
   0xb   :  { %v158_v23 = vadd.f32 %v157_v21, %v156_v17  ;;  %v1022_v49 = vpop.eup %1021 }
   0xc   :  { %v150_v24 = vrot.slane %v149_v22, 2  ;;  %v197_v38 = vadd.f32 %v196_v32, %v190_v31  ;;  %v179_v53 = vmul.f32 %v1020_v45, %v178_v48  ;;  %v213_v54 = vmul.f32 8191.0, %v1022_v49  ;;  %v284_v31 = vld [vmem:[%s1677_s1] sm:$0xff]  ;;  %v1210_v48 = vld [vmem:[%s1676_s0 + $0x70] sm:$0xff] }
   0xd   :  { %v159_v27 = vrot.slane %v158_v23, 2  ;;  %vm217_vm2 = vweird.f32 %v1022_v49 }
   0xe   :  { %v151_v28 = vadd.f32 %v150_v24, %v149_v22  ;;  %v198_v42 = vadd.f32 %v197_v38, %v191_v37  ;;  %v180_v57 = vadd.f32 %v1020_v45, %v179_v53  ;;  %v214_v58 = vsub.f32 1.0, %v213_v54  ;;  %v285_v38 = vld [vmem:[%s1677_s1 + $0x8] sm:$0xff] }
   0xf   :  { %v160_v29 = vadd.f32 %v159_v27, %v158_v23  ;;  %v115_v22 = vlaneseq }
  0x10   :  { %v152_v30 = vrot.slane %v151_v28, 1  ;;  %v199_v43 = vadd.f32 %v198_v42, %v192_v41  ;;  %v182_v0 = vsel %vm181_vm1, %v1020_v45, %v180_v57  ;;  %v215_v1 = vmul.f32 %v1022_v49, %v214_v58  ;;  %v1185_v41 = vld [vmem:[%s1676_s0 + $0x50] sm:$0xff]  ;;  %v1190_v42 = vld [vmem:[%s1676_s0 + $0x58] sm:$0xff]  ;;  %v1202_v45 = vld [vmem:[%s1676_s0 + $0x68] sm:$0xff] }
  0x11   :  { %v161_v33 = vrot.slane %v160_v29, 1  ;;  %v1148_v24 = vand.u32 127, %v115_v22 }
  0x12   :  { %v1114_v34 = vadd.f32 %v152_v30, %v151_v28  ;;  %v216_v4 = vadd.f32 %v1022_v49, %v215_v1  ;;  %v1047_v30 = vmov 0  }
  0x13   :  { %v1116_v35 = vadd.f32 %v161_v33, %v160_v29  ;;  %vm260_vm6 = vcmp.lt.s32.totalorder %v1148_v24, 16  ;;  %1017 = vset.pattern.permute.xlu1 %v1047_v30  ;;  %1016 = vset.pattern.permute.xlu2 %v1047_v30  ;;  %vm269_vm7 = vcmp.lt.s32.totalorder %v1148_v24, 32  ;;  %vm278_vm8 = vcmp.lt.s32.totalorder %v1148_v24, 64 }
  0x14   :  { %v164_v36 = vsel %vm163_vm0, %v1114_v34, 0.0  ;;  %v218_v7 = vsel %vm217_vm2, %v1022_v49, %v216_v4  ;;  %1018 = vset.pattern.permute.xlu0 %v1047_v30  ;;  %v1215_v49 = vld [vmem:[%s1676_s0 + $0x78] sm:$0xff] }
  0x15   :  { %v165_v39 = vsel %vm163_vm0, %v1116_v35, 0.0 }
  0x16   :  { %v166_v40 = vadd.f32 %v165_v39, %v164_v36  ;;  %v1175_v39 = vld [vmem:[%s1676_s0 + $0x40] sm:$0xff] }
  0x18   :  { %167 = vadd.xlane.f32.xlu0 %v166_v40  ;;  %v1180_v40 = vld [vmem:[%s1676_s0 + $0x48] sm:$0xff] }
  0x19   :  { %v426_v46 = vadd.f32 %v1190_v42, %v1180_v40 }
  0x20   :  { %200 = vadd.xlane.f32.xlu0 %v199_v43  ;;  %v417_v43 = vadd.f32 %v1185_v41, %v1175_v39 }
  0x22   :  { %v418_v47 = vadd.f32 %v417_v43, %v1197_v44 }
  0x8b   :  { %v168_v50 = vpop.xlane.xlu0 %167 }
  0x8c   :  { %v169_v51 = vrot.slane %v168_v50, 4 }
  0x8e   :  { %v170_v52 = vadd.f32 %v169_v51, %v168_v50  ;;  %v427_v50 = vadd.f32 %v426_v46, %v1202_v45  ;;  %v419_v51 = vadd.f32 %v418_v47, %v1210_v48  ;;  %v1049_v47 = vmov 4096.0  }
  0x90   :  { %v171_v55 = vrot.slane %v170_v52, 2  ;;  %v420_v53 = vrot.slane %v419_v51, 4 }
  0x92   :  { %v172_v56 = vadd.f32 %v171_v55, %v170_v52  ;;  %v428_v52 = vadd.f32 %v427_v50, %v1215_v49  ;;  %v421_v55 = vadd.f32 %v420_v53, %v419_v51 }
  0x93   :  { %v201_v59 = vpop.xlane.xlu0 %200 }
  0x94   :  { %v202_v60 = vrot.slane %v201_v59, 4  ;;  %v173_v61 = vrot.slane %v172_v56, 1  ;;  %v429_v54 = vrot.slane %v428_v52, 4  ;;  %v422_v57 = vrot.slane %v421_v55, 2 }
  0x96   :  { %v203_v62 = vadd.f32 %v202_v60, %v201_v59  ;;  %v174_v63 = vadd.f32 %v173_v61, %v172_v56  ;;  %v430_v56 = vadd.f32 %v429_v54, %v428_v52  ;;  %v456_v59 = vmul.f32 %v1175_v39, %v1175_v39 }
  0x97   :  { %v457_v60 = vmul.f32 %v1180_v40, %v1180_v40  ;;  %v423_v61 = vadd.f32 %v422_v57, %v421_v55 }
  0x98   :  { %v204_v2 = vrot.slane %v203_v62, 2  ;;  %979 = vpush %v174_v63  ;;  %v431_v58 = vrot.slane %v430_v56, 2  ;;  %v458_v63 = vmul.f32 %v1185_v41, %v1185_v41 }
  0x99   :  { %981 = vpush %v182_v0  ;;  %v464_v0 = vadd.f32 %v457_v60, %v456_v59  ;;  %v424_v1 = vrot.slane %v423_v61, 1 }
  0x9a   :  { %v205_v3 = vadd.f32 %v204_v2, %v203_v62  ;;  %v432_v62 = vadd.f32 %v431_v58, %v430_v56 }
  0x9b   :  { %v465_v4 = vadd.f32 %v464_v0, %v458_v63 }
  0x9c   :  { %v206_v5 = vrot.slane %v205_v3, 1  ;;  %v433_v2 = vrot.slane %v432_v62, 1 }
  0x9e   :  { %v207_v6 = vadd.f32 %v206_v5, %v205_v3  ;;  %v459_v3 = vmul.f32 %v1190_v42, %v1190_v42  ;;  %v1228_v5 = vadd.f32 %v424_v1, %v423_v61 }
  0xa0   :  { %983 = vpush %v207_v6  ;;  %v1230_v6 = vadd.f32 %v433_v2, %v432_v62 }
  0xa1   :  { %985 = vpush %v218_v7  ;;  %v460_v7 = vmul.f32 %v1197_v44, %v1197_v44 }
  0xc9   :  { %s980_s17 = spop %979 }
  0xca   :  { %s1122_s18 = spop %981 }
  0xcb   :  { %s1125_s19 = smul.f32 %s1122_s18, %s980_s17 }
  0xcd   :  { %s209_s20 = smul.f32 8192.0, %s1125_s19 }
  0xce   :  { %s233_s26 = smul.f32 32.0, %s1125_s19 }
  0xcf   :  { %s210_s21 = smul.f32 %s209_s20, %s1125_s19 }
  0xd0   :  { %v234_v16 = vstv %s233_s26 }
  0xd1   :  { %s984_s22 = spop %983  ;;  %v235_v17 = vsub.f32 %v1114_v34, %v234_v16  ;;  %v236_v20 = vsub.f32 %v1116_v35, %v234_v16 }
  0xd2   :  { %s211_s23 = ssub.f32 %s984_s22, %s210_s21  ;;  %s1129_s24 = spop %985 }
  0xd4   :  { %s220_s25 = smul.f32 %s1129_s24, %s211_s23 }
  0xd6   :  { %v221_v8 = vstv %s220_s25 }
  0xd7   :  { %1023 = vrsqrt.f32 %v221_v8  ;;  %vm228_vm4 = vweird.f32 %v221_v8 }
  0xd8   :  { %1025 = vrcp.f32 %v1049_v47 }
  0xdd   :  { %v1024_v9 = vpop.eup %1023 }
  0xde   :  { %v223_v10 = vmul.f32 %v1024_v9, %v221_v8  ;;  %vm229_vm3 = vweird.f32 %v1024_v9  ;;  %v466_v8 = vadd.f32 %v465_v4, %v459_v3  ;;  %v1026_v50 = vpop.eup %1025 }
  0xdf   :  { %vm230_vm5 = vmor %vm228_vm4, %vm229_vm3  ;;  %v312_v53 = vmul.f32 4096.0, %v1026_v50  ;;  %vm316_vm9 = vweird.f32 %v1026_v50  ;;  %vm53_vm4 = vcmask 785408  }
  0xe0   :  { %v224_v11 = vmul.f32 %v1024_v9, %v223_v10  ;;  %v436_v10 = vsel %vm163_vm0, %v1230_v6, 0.0 }
  0xe1   :  { %v313_v56 = vsub.f32 1.0, %v312_v53  ;;  %v553_v53 = vld [vmem:[%s1677_s1 + $0x18] sm:$0xff] }
  0xe2   :  { %v225_v12 = vmul.f32 0.5, %v224_v11  ;;  %v461_v11 = vmul.f32 %v1202_v45, %v1202_v45 }
  0xe3   :  { %v314_v62 = vmul.f32 %v1026_v50, %v313_v56  ;;  %v679_v56 = vld [vmem:[%s1676_s0 + $0x90] sm:$0xff] }
  0xe4   :  { %v226_v13 = vsub.f32 1.5, %v225_v12 }
  0xe5   :  { %v315_v3 = vadd.f32 %v1026_v50, %v314_v62 }
  0xe6   :  { %v227_v14 = vmul.f32 %v1024_v9, %v226_v13  ;;  %v462_v13 = vmul.f32 %v1210_v48, %v1210_v48 }
  0xe8   :  { %v231_v15 = vsel %vm230_vm5, %v1024_v9, %v227_v14  ;;  %v435_v9 = vsel %vm163_vm0, %v1228_v5, 0.0  ;;  %v467_v14 = vadd.f32 %v466_v8, %v460_v7 }
  0xe9   :  { %987 = vpush %v231_v15  ;;  %v437_v12 = vadd.f32 %v436_v10, %v435_v9  ;;  %v463_v15 = vmul.f32 %v1215_v49, %v1215_v49  ;;  %v317_v10 = vsel %vm316_vm9, %v1026_v50, %v315_v3 }
  0xea   :  { %v468_v16 = vadd.f32 %v467_v14, %v461_v11 }
 0x11a   :  { %s988_s27 = spop %987 }
 0x11b   :  { %v1134_v18 = vstv %s988_s27 }
 0x11c   :  { %v1137_v19 = vmul.f32 %v1134_v18, %v235_v17  ;;  %v1143_v21 = vmul.f32 %v1134_v18, %v236_v20  ;;  %v469_v17 = vadd.f32 %v468_v16, %v462_v13 }
 0x11e   :  { %256 = vrot.lane.b32.xlu1 %v1137_v19, %s1045_s28  ;;  %v470_v20 = vadd.f32 %v469_v17, %v463_v15 }
 0x126   :  { %258 = vrot.lane.b32.xlu1 %v1143_v21, %s1045_s28 }
 0x190   :  { %v257_v23 = vpop.permute.xlu1 %256 }
 0x198   :  { %v259_v25 = vpop.permute.xlu1 %258 }
 0x199   :  { %v262_v26 = vsel %vm260_vm6, %v259_v25, %v257_v23  ;;  %v261_v28 = vsel %vm260_vm6, %v257_v23, %v259_v25 }
 0x19a   :  { %v263_v27 = vadd.f32 %v262_v26, %v1137_v19  ;;  %v264_v29 = vadd.f32 %v261_v28, %v1143_v21 }
 0x19c   :  { %265 = vrot.lane.b32.xlu2 %v263_v27, %s1046_s29 }
 0x1a4   :  { %267 = vrot.lane.b32.xlu2 %v264_v29, %s1046_s29 }
 0x1ac   :  { %288 = vperm.xlu2 %1016, %v284_v31  }
 0x1f6   :  { %v266_v32 = vpop.permute.xlu2 %265 }
 0x1fe   :  { %v268_v33 = vpop.permute.xlu2 %267 }
 0x1ff   :  { %v270_v34 = vsel %vm269_vm7, %v266_v32, %v268_v33  ;;  %v271_v35 = vsel %vm269_vm7, %v268_v33, %v266_v32 }
 0x200   :  { %v272_v36 = vadd.f32 %v271_v35, %v263_v27  ;;  %v273_v37 = vadd.f32 %v270_v34, %v264_v29 }
 0x202   :  { %274 = vrot.lane.b32.xlu0 %v272_v36, %s1048_s9  ;;  %276 = vrot.lane.b32.xlu1 %v273_v37, %s1048_s9 }
 0x206   :  { %v289_v31 = vpop.permute.xlu2 %288 }
 0x20a   :  { %293 = vperm.xlu1 %1017, %v285_v38  }
 0x22c   :  { %471 = vadd.xlane.f32.xlu0 %v470_v20 }
 0x234   :  { %438 = vadd.xlane.f32.xlu1 %v437_v12 }
 0x274   :  { %v275_v23 = vpop.permute.xlu0 %274  ;;  %v277_v25 = vpop.permute.xlu1 %276 }
 0x275   :  { %v279_v26 = vsel %vm278_vm8, %v275_v23, %v277_v25  ;;  %v280_v27 = vsel %vm278_vm8, %v277_v25, %v275_v23 }
 0x276   :  { %v281_v28 = vadd.f32 %v280_v27, %v272_v36  ;;  %v282_v29 = vadd.f32 %v279_v26, %v273_v37 }
 0x278   :  { %v283_v30 = vadd.f32 %v282_v29, %v281_v28 }
 0x27a   :  { %v296_v32 = vperm.slane %v283_v30, 0 }
 0x27c   :  { %v1249_v33 = vmul.f32 %v296_v32, %v289_v31  ;;  %v294_v34 = vpop.permute.xlu1 %293 }
 0x27d   :  { %v1251_v35 = vmul.f32 %v296_v32, %v294_v34 }
 0x27e   :  { %v299_v38 = vadd.f32 %v1249_v33, %v1249_v33 }
 0x280   :  { %v300_v43 = vadd.f32 %v299_v38, %v1251_v35 }
 0x282   :  { %v301_v46 = vadd.f32 %v300_v43, %v1251_v35 }
 0x284   :  { %302 = vadd.xlane.f32.xlu2 %v301_v46 }
 0x29f   :  { %v472_v36 = vpop.xlane.xlu0 %471 }
 0x2a0   :  { %v473_v51 = vrot.slane %v472_v36, 4 }
 0x2a2   :  { %v474_v54 = vadd.f32 %v473_v51, %v472_v36 }
 0x2a4   :  { %v475_v57 = vrot.slane %v474_v54, 2 }
 0x2a6   :  { %v476_v63 = vadd.f32 %v475_v57, %v474_v54  ;;  %v677_v54 = vld [vmem:[%s1676_s0 + $0x80] sm:$0xff]  ;;  %v680_v57 = vld [vmem:[%s1676_s0 + $0x98] sm:$0xff] }
 0x2a7   :  { %v439_v37 = vpop.xlane.xlu1 %438 }
 0x2a8   :  { %v440_v52 = vrot.slane %v439_v37, 4  ;;  %v477_v4 = vrot.slane %v476_v63, 1 }
 0x2aa   :  { %v441_v55 = vadd.f32 %v440_v52, %v439_v37  ;;  %v478_v11 = vadd.f32 %v477_v4, %v476_v63  ;;  %v683_v63 = vld [vmem:[%s1676_s0 + $0xb0] sm:$0xff] }
 0x2ab   :  { %67 = vmatpush.msra.mxu0 %v683_v63  ;;  %955 = vmatpush.msra.mxu2 %v683_v63 }
 0x2ac   :  { %v442_v59 = vrot.slane %v441_v55, 2 }
 0x2ae   :  { %v443_v1 = vadd.f32 %v442_v59, %v441_v55  ;;  %v678_v55 = vld [vmem:[%s1676_s0 + $0x88] sm:$0xff]  ;;  %v681_v59 = vld [vmem:[%s1676_s0 + $0xa0] sm:$0xff] }
 0x2af   :  { %68 = vmatpush.msra.mxu0 %v681_v59  ;;  %956 = vmatpush.msra.mxu2 %v681_v59 }
 0x2b0   :  { %v444_v8 = vrot.slane %v443_v1, 1 }
 0x2b1   :  { %69 = vmatpush.msra.mxu0 %v679_v56  ;;  %957 = vmatpush.msra.mxu2 %v679_v56 }
 0x2b2   :  { %v445_v12 = vadd.f32 %v444_v8, %v443_v1 }
 0x2b3   :  { %70 = vmatpush.msra.mxu0 %v677_v54  ;;  %958 = vmatpush.msra.mxu2 %v677_v54 }
 0x2b5   :  { %71 = vmatpush.msra.mxu0 %v1210_v48  ;;  %959 = vmatpush.msra.mxu2 %v1210_v48 }
 0x2b7   :  { %72 = vmatpush.msra.mxu0 %v1197_v44  ;;  %960 = vmatpush.msra.mxu2 %v1197_v44 }
 0x2b9   :  { %73 = vmatpush.msra.mxu0 %v1185_v41  ;;  %961 = vmatpush.msra.mxu2 %v1185_v41 }
 0x2bb   :  { %74 = vmatpush.msra.mxu0 %v1175_v39  ;;  %962 = vmatpush.msra.mxu2 %v1175_v39 }
 0x2f7   :  { %v303_v58 = vpop.xlane.xlu2 %302 }
 0x2f8   :  { %v304_v60 = vrot.slane %v303_v58, 4 }
 0x2fa   :  { %v305_v61 = vadd.f32 %v304_v60, %v303_v58  ;;  %v685_v58 = vadd.f32 %v679_v56, %v677_v54  ;;  %v682_v60 = vld [vmem:[%s1676_s0 + $0xa8] sm:$0xff] }
 0x2fb   :  { %v729_v44 = vmul.f32 %v682_v60, %v682_v60 }
 0x2fc   :  { %v306_v0 = vrot.slane %v305_v61, 2  ;;  %v686_v62 = vadd.f32 %v685_v58, %v681_v59 }
 0x2fe   :  { %v307_v2 = vadd.f32 %v306_v0, %v305_v61  ;;  %v694_v61 = vadd.f32 %v680_v57, %v678_v55  ;;  %v684_v0 = vld [vmem:[%s1676_s0 + $0xb8] sm:$0xff] }
 0x2ff   :  { %93 = vmatpush.msra.mxu1 %v684_v0  ;;  %967 = vmatpush.msra.mxu3 %v684_v0 }
 0x300   :  { %v308_v7 = vrot.slane %v307_v2, 1  ;;  %v695_v1 = vadd.f32 %v694_v61, %v682_v60 }
 0x301   :  { %94 = vmatpush.msra.mxu1 %v682_v60  ;;  %968 = vmatpush.msra.mxu3 %v682_v60 }
 0x302   :  { %v309_v9 = vadd.f32 %v308_v7, %v307_v2  ;;  %v687_v2 = vadd.f32 %v686_v62, %v683_v63  ;;  %v696_v3 = vadd.f32 %v695_v1, %v684_v0 }
 0x303   :  { %95 = vmatpush.msra.mxu1 %v680_v57  ;;  %969 = vmatpush.msra.mxu3 %v680_v57 }
 0x304   :  { %989 = vpush %v309_v9  ;;  %v688_v4 = vrot.slane %v687_v2, 4  ;;  %v697_v7 = vrot.slane %v696_v3, 4 }
 0x305   :  { %991 = vpush %v317_v10  ;;  %96 = vmatpush.msra.mxu1 %v678_v55  ;;  %970 = vmatpush.msra.mxu3 %v678_v55 }
 0x306   :  { %993 = vpush %v445_v12  ;;  %v689_v8 = vadd.f32 %v688_v4, %v687_v2  ;;  %v698_v9 = vadd.f32 %v697_v7, %v696_v3  ;;  %v724_v12 = vmul.f32 %v677_v54, %v677_v54 }
 0x307   :  { %995 = vpush %v478_v11  ;;  %97 = vmatpush.msra.mxu1 %v1215_v49  ;;  %971 = vmatpush.msra.mxu3 %v1215_v49  ;;  %v728_v49 = vmul.f32 %v681_v59, %v681_v59 }
 0x308   :  { %v690_v10 = vrot.slane %v689_v8, 2  ;;  %v699_v11 = vrot.slane %v698_v9, 2 }
 0x309   :  { %98 = vmatpush.msra.mxu1 %v1202_v45  ;;  %972 = vmatpush.msra.mxu3 %v1202_v45 }
 0x30b   :  { %99 = vmatpush.msra.mxu1 %v1190_v42  ;;  %973 = vmatpush.msra.mxu3 %v1190_v42 }
 0x30d   :  { %100 = vmatpush.msra.mxu1 %v1180_v40  ;;  %974 = vmatpush.msra.mxu3 %v1180_v40 }
 0x335   :  { %s1257_s11 = spop %989 }
 0x336   :  { %s1259_s12 = spop %991 }
 0x337   :  { %s994_s13 = spop %993 }
 0x338   :  { %s1262_s14 = smul.f32 %s994_s13, %s1122_s18  ;;  %s996_s17 = spop %995 }
 0x33a   :  { %s480_s15 = smul.f32 8192.0, %s1262_s14 }
 0x33b   :  { %s504_s22 = smul.f32 32.0, %s1262_s14 }
 0x33c   :  { %s481_s16 = smul.f32 %s480_s15, %s1262_s14 }
 0x33d   :  { %v505_v26 = vstv %s504_s22 }
 0x33e   :  { %s482_s20 = ssub.f32 %s996_s17, %s481_s16  ;;  %v507_v27 = vsub.f32 %v1230_v6, %v505_v26  ;;  %v506_v28 = vsub.f32 %v1228_v5, %v505_v26  ;;  %v552_v6 = vld [vmem:[%s1677_s1 + $0x10] sm:$0xff] }
 0x340   :  { %s491_s21 = smul.f32 %s1129_s24, %s482_s20 }
 0x342   :  { %v492_v13 = vstv %s491_s21 }
 0x343   :  { %1027 = vrsqrt.f32 %v492_v13  ;;  %vm499_vm11 = vweird.f32 %v492_v13 }
 0x349   :  { %v1028_v14 = vpop.eup %1027 }
 0x34a   :  { %v494_v15 = vmul.f32 %v1028_v14, %v492_v13  ;;  %vm500_vm10 = vweird.f32 %v1028_v14  ;;  %v725_v13 = vmul.f32 %v678_v55, %v678_v55 }
 0x34b   :  { %vm501_vm12 = vmor %vm499_vm11, %vm500_vm10 }
 0x34c   :  { %v495_v16 = vmul.f32 %v1028_v14, %v494_v15  ;;  %v700_v15 = vadd.f32 %v699_v11, %v698_v9 }
 0x34e   :  { %v496_v17 = vmul.f32 0.5, %v495_v16  ;;  %v726_v16 = vmul.f32 %v679_v56, %v679_v56 }
 0x350   :  { %v497_v20 = vsub.f32 1.5, %v496_v17  ;;  %v732_v17 = vadd.f32 %v725_v13, %v724_v12 }
 0x352   :  { %v498_v23 = vmul.f32 %v1028_v14, %v497_v20  ;;  %v733_v26 = vadd.f32 %v732_v17, %v726_v16 }
 0x354   :  { %v502_v25 = vsel %vm501_vm12, %v1028_v14, %v498_v23  ;;  %v691_v14 = vadd.f32 %v690_v10, %v689_v8  ;;  %v701_v23 = vrot.slane %v700_v15, 1 }
 0x355   :  { %997 = vpush %v502_v25  ;;  %v727_v25 = vmul.f32 %v680_v57, %v680_v57 }
 0x356   :  { %v692_v20 = vrot.slane %v691_v14, 1  ;;  %v1344_v48 = vadd.f32 %v701_v23, %v700_v15 }
 0x358   :  { %v704_v45 = vsel %vm163_vm0, %v1344_v48, 0.0 }
 0x386   :  { %s998_s23 = spop %997 }
 0x387   :  { %v1270_v29 = vstv %s998_s23 }
 0x388   :  { %v1273_v30 = vmul.f32 %v1270_v29, %v507_v27  ;;  %v1276_v31 = vmul.f32 %v1270_v29, %v506_v28  ;;  %v1340_v27 = vadd.f32 %v692_v20, %v691_v14  ;;  %v734_v28 = vadd.f32 %v733_v26, %v727_v25 }
 0x38a   :  { %529 = vrot.lane.b32.xlu1 %v1273_v30, %s1045_s28  ;;  %527 = vrot.lane.b32.xlu2 %v1276_v31, %s1045_s28 }
 0x392   :  { %556 = vperm.xlu1 %1017, %v552_v6   ;;  %v703_v6 = vsel %vm163_vm0, %v1340_v27, 0.0 }
 0x393   :  { %v705_v41 = vadd.f32 %v704_v45, %v703_v6 }
 0x3bc   :  { %706 = vadd.xlane.f32.xlu1 %v705_v41 }
 0x3e4   :  { %v528_v5 = vpop.permute.xlu2 %527 }
 0x3fc   :  { %v530_v32 = vpop.permute.xlu1 %529 }
 0x3fd   :  { %v531_v34 = vsel %vm260_vm6, %v528_v5, %v530_v32  ;;  %v532_v38 = vsel %vm260_vm6, %v530_v32, %v528_v5  ;;  %v730_v5 = vmul.f32 %v683_v63, %v683_v63  ;;  %v735_v32 = vadd.f32 %v734_v28, %v728_v49 }
 0x3fe   :  { %v533_v43 = vadd.f32 %v532_v38, %v1276_v31  ;;  %v534_v46 = vadd.f32 %v531_v34, %v1273_v30  ;;  %v731_v34 = vmul.f32 %v684_v0, %v684_v0 }
 0x3ff   :  { %v736_v42 = vadd.f32 %v735_v32, %v729_v44 }
 0x400   :  { %535 = vrot.lane.b32.xlu0 %v533_v43, %s1046_s29  ;;  %537 = vrot.lane.b32.xlu2 %v534_v46, %s1046_s29 }
 0x401   :  { %v737_v38 = vadd.f32 %v736_v42, %v730_v5 }
 0x404   :  { %v557_v54 = vpop.permute.xlu1 %556 }
 0x45a   :  { %v538_v47 = vpop.permute.xlu2 %537 }
 0x472   :  { %v536_v36 = vpop.permute.xlu0 %535 }
 0x473   :  { %v539_v37 = vsel %vm269_vm7, %v536_v36, %v538_v47  ;;  %v540_v50 = vsel %vm269_vm7, %v538_v47, %v536_v36 }
 0x474   :  { %v1297_v51 = vadd.f32 %v540_v50, %v533_v43  ;;  %v1299_v52 = vadd.f32 %v539_v37, %v534_v46  ;;  %v738_v43 = vadd.f32 %v737_v38, %v731_v34 }
 0x476   :  { %543 = vrot.lane.b32.xlu2 %v1297_v51, %s1048_s9  ;;  %545 = vrot.lane.b32.xlu0 %v1299_v52, %s1048_s9 }
 0x47e   :  { %561 = vperm.xlu2 %1016, %v553_v53  }
 0x4a7   :  { %739 = vadd.xlane.f32.xlu2 %v738_v43 }
 0x4d0   :  { %v544_v46 = vpop.permute.xlu2 %543 }
 0x4d8   :  { %v562_v56 = vpop.permute.xlu2 %561 }
 0x4e8   :  { %v546_v47 = vpop.permute.xlu0 %545 }
 0x4e9   :  { %v547_v36 = vsel %vm278_vm8, %v544_v46, %v546_v47  ;;  %v548_v37 = vsel %vm278_vm8, %v546_v47, %v544_v46 }
 0x4ea   :  { %v549_v50 = vadd.f32 %v548_v37, %v1297_v51  ;;  %v550_v39 = vadd.f32 %v547_v36, %v1299_v52  ;;  %v707_v51 = vpop.xlane.xlu1 %706  ;;  %v820_v36 = vld [vmem:[%s1677_s1 + $0x20] sm:$0xff] }
 0x4eb   :  { %v708_v52 = vrot.slane %v707_v51, 4 }
 0x4ec   :  { %v551_v40 = vadd.f32 %v550_v39, %v549_v50 }
 0x4ed   :  { %v709_v0 = vadd.f32 %v708_v52, %v707_v51 }
 0x4ee   :  { %v564_v53 = vperm.slane %v551_v40, 0 }
 0x4ef   :  { %v710_v2 = vrot.slane %v709_v0, 2 }
 0x4f0   :  { %v1362_v55 = vmul.f32 %v564_v53, %v557_v54  ;;  %v1364_v57 = vmul.f32 %v564_v53, %v562_v56 }
 0x4f1   :  { %v711_v9 = vadd.f32 %v710_v2, %v709_v0 }
 0x4f2   :  { %v567_v58 = vadd.f32 %v1362_v55, %v1362_v55 }
 0x4f3   :  { %v712_v13 = vrot.slane %v711_v9, 1 }
 0x4f4   :  { %v568_v59 = vadd.f32 %v567_v58, %v1364_v57 }
 0x4f5   :  { %v713_v17 = vadd.f32 %v712_v13, %v711_v9 }
 0x4f6   :  { %v569_v60 = vadd.f32 %v568_v59, %v1364_v57  ;;  %v821_v59 = vld [vmem:[%s1677_s1 + $0x28] sm:$0xff] }
 0x4f8   :  { %570 = vadd.xlane.f32.xlu0 %v569_v60 }
 0x51a   :  { %v740_v61 = vpop.xlane.xlu2 %739 }
 0x51b   :  { %v741_v62 = vrot.slane %v740_v61, 4 }
 0x51d   :  { %v742_v63 = vadd.f32 %v741_v62, %v740_v61 }
 0x51f   :  { %v743_v1 = vrot.slane %v742_v63, 2 }
 0x521   :  { %v744_v8 = vadd.f32 %v743_v1, %v742_v63 }
 0x523   :  { %v745_v12 = vrot.slane %v744_v8, 1 }
 0x525   :  { %v746_v16 = vadd.f32 %v745_v12, %v744_v8 }
 0x56b   :  { %v571_v3 = vpop.xlane.xlu0 %570 }
 0x56c   :  { %v572_v4 = vrot.slane %v571_v3, 4 }
 0x56e   :  { %v573_v7 = vadd.f32 %v572_v4, %v571_v3 }
 0x570   :  { %v574_v10 = vrot.slane %v573_v7, 2 }
 0x572   :  { %v575_v11 = vadd.f32 %v574_v10, %v573_v7 }
 0x574   :  { %v576_v14 = vrot.slane %v575_v11, 1 }
 0x576   :  { %v577_v15 = vadd.f32 %v576_v14, %v575_v11 }
 0x578   :  { %999 = vpush %v577_v15 }
 0x579   :  { %1001 = vpush %v713_v17 }
 0x57a   :  { %1003 = vpush %v746_v16 }
 0x5a9   :  { %s1370_s13 = spop %999 }
 0x5aa   :  { %s1002_s15 = spop %1001  ;;  %s587_s8 = smul.f32 %s1370_s13, %s1259_s12 }
 0x5ab   :  { %s1373_s16 = smul.f32 %s1002_s15, %s1122_s18  ;;  %s1004_s21 = spop %1003 }
 0x5ac   :  { %v588_v61 = vstv %s587_s8 }
 0x5ad   :  { %s748_s17 = smul.f32 8192.0, %s1373_s16  ;;  %vm589_vm2 = vcmp.gt.f32.partialorder %v1362_v55, %v588_v61  ;;  %vm590_vm3 = vcmp.gt.f32.partialorder %v1364_v57, %v588_v61 }
 0x5ae   :  { %s772_s18 = smul.f32 32.0, %s1373_s16  ;;  %v1426_v51 = vsel %vm589_vm2, %v1362_v55, 0.0  ;;  %v1451_v17 = vsel %vm590_vm3, %v1364_v57, 0.0  ;;  %v33_v57 = vld [vmem:[%s1676_s0 + $0x20] sm:$0xff] }
 0x5af   :  { %s749_s20 = smul.f32 %s748_s17, %s1373_s16 }
 0x5b0   :  { %v773_v45 = vstv %s772_s18 }
 0x5b1   :  { %s750_s22 = ssub.f32 %s1004_s21, %s749_s20  ;;  %v775_v5 = vsub.f32 %v1344_v48, %v773_v45  ;;  %v774_v32 = vsub.f32 %v1340_v27, %v773_v45  ;;  %v36_v45 = vld [vmem:[%s1676_s0 + $0x38] sm:$0xff] }
 0x5b2   :  { %101 = vmatpush.msra.mxu1 %v36_v45  ;;  %975 = vmatpush.msra.mxu3 %v36_v45 }
 0x5b3   :  { %s759_s23 = smul.f32 %s1129_s24, %s750_s22 }
 0x5b5   :  { %v760_v20 = vstv %s759_s23 }
 0x5b6   :  { %1029 = vrsqrt.f32 %v760_v20  ;;  %vm767_vm14 = vweird.f32 %v760_v20 }
 0x5bc   :  { %v1030_v23 = vpop.eup %1029 }
 0x5bd   :  { %v762_v25 = vmul.f32 %v1030_v23, %v760_v20  ;;  %vm768_vm13 = vweird.f32 %v1030_v23 }
 0x5be   :  { %vm769_vm15 = vmor %vm767_vm14, %vm768_vm13 }
 0x5bf   :  { %v763_v26 = vmul.f32 %v1030_v23, %v762_v25 }
 0x5c1   :  { %v764_v49 = vmul.f32 0.5, %v763_v26 }
 0x5c3   :  { %v765_v28 = vsub.f32 1.5, %v764_v49 }
 0x5c5   :  { %v766_v6 = vmul.f32 %v1030_v23, %v765_v28 }
 0x5c7   :  { %v770_v44 = vsel %vm769_vm15, %v1030_v23, %v766_v6 }
 0x5c8   :  { %1005 = vpush %v770_v44  ;;  %v35_v44 = vld [vmem:[%s1676_s0 + $0x30] sm:$0xff] }
 0x5c9   :  { %75 = vmatpush.msra.mxu0 %v35_v44  ;;  %963 = vmatpush.msra.mxu2 %v35_v44 }
 0x5cb   :  { %76 = vmatpush.msra.mxu0 %v33_v57  ;;  %964 = vmatpush.msra.mxu2 %v33_v57 }
 0x5f9   :  { %s1006_s25 = spop %1005 }
 0x5fa   :  { %v1381_v41 = vstv %s1006_s25 }
 0x5fb   :  { %v1384_v34 = vmul.f32 %v1381_v41, %v775_v5  ;;  %v1387_v42 = vmul.f32 %v1381_v41, %v774_v32  ;;  %v34_v5 = vld [vmem:[%s1676_s0 + $0x28] sm:$0xff] }
 0x5fc   :  { %102 = vmatpush.msra.mxu1 %v34_v5  ;;  %976 = vmatpush.msra.mxu3 %v34_v5 }
 0x5fd   :  { %797 = vrot.lane.b32.xlu1 %v1384_v34, %s1045_s28  ;;  %795 = vrot.lane.b32.xlu0 %v1387_v42, %s1045_s28  ;;  %s319_s28 = smul.f32 %s1259_s12, %s1257_s11 }
 0x5ff   :  { %v320_v37 = vstv %s319_s28 }
 0x600   :  { %vm321_vm0 = vcmp.gt.f32.partialorder %v1249_v33, %v320_v37  ;;  %vm322_vm1 = vcmp.gt.f32.partialorder %v1251_v35, %v320_v37 }
 0x601   :  { %v323_v50 = vsel %vm321_vm0, %v1249_v33, 0.0  ;;  %v241_v33 = vld [vmem:[%s1678_s3] sm:$0xff]  ;;  %v324_v60 = vsel %vm322_vm1, %v1251_v35, 0.0 }
 0x66f   :  { %v798_v38 = vpop.permute.xlu1 %797  ;;  %v796_v48 = vpop.permute.xlu0 %795 }
 0x670   :  { %v799_v27 = vsel %vm260_vm6, %v796_v48, %v798_v38  ;;  %v800_v43 = vsel %vm260_vm6, %v798_v38, %v796_v48  ;;  %v31_v38 = vld [vmem:[%s1676_s0 + $0x10] sm:$0xff]  ;;  %v32_v48 = vld [vmem:[%s1676_s0 + $0x18] sm:$0xff] }
 0x671   :  { %v801_v46 = vadd.f32 %v800_v43, %v1387_v42  ;;  %v802_v47 = vadd.f32 %v799_v27, %v1384_v34  ;;  %77 = vmatpush.msra.mxu0 %v31_v38  ;;  %103 = vmatpush.msra.mxu1 %v32_v48  ;;  %v29_v27 = vld [vmem:[%s1676_s0] sm:$0xff]  ;;  %v30_v43 = vld [vmem:[%s1676_s0 + $0x8] sm:$0xff] }
 0x672   :  { %965 = vmatpush.msra.mxu2 %v31_v38  ;;  %977 = vmatpush.msra.mxu3 %v32_v48 }
 0x673   :  { %803 = vrot.lane.b32.xlu2 %v801_v46, %s1046_s29  ;;  %805 = vrot.lane.b32.xlu0 %v802_v47, %s1046_s29 }
 0x674   :  { %78 = vmatpush.msra.mxu0 %v29_v27  ;;  %104 = vmatpush.msra.mxu1 %v30_v43 }
 0x675   :  { %966 = vmatpush.msra.mxu2 %v29_v27  ;;  %978 = vmatpush.msra.mxu3 %v30_v43 }
 0x67b   :  { %824 = vperm.xlu2 %1016, %v820_v36  }
 0x6a4   :  { %325 = vmin.xlane.f32.xlu2 %v323_v50 }
 0x6cd   :  { %v804_v39 = vpop.permute.xlu2 %803 }
 0x6d5   :  { %v825_v4 = vpop.permute.xlu2 %824 }
 0x6e5   :  { %v806_v40 = vpop.permute.xlu0 %805 }
 0x6e6   :  { %v807_v53 = vsel %vm269_vm7, %v804_v39, %v806_v40  ;;  %v808_v54 = vsel %vm269_vm7, %v806_v40, %v804_v39 }
 0x6e7   :  { %v809_v56 = vadd.f32 %v808_v54, %v801_v46  ;;  %v810_v58 = vadd.f32 %v807_v53, %v802_v47  ;;  %v26_v46 = vld [vmem:[%s1679_s4] sm:$0xff] }
 0x6e8   :  { %949 = vmatmul.msk.f32.vlgmr.msra.gmra.mxu0 %vm53_vm4, %v26_v46  ;;  %952 = vmatmul.msk.f32.vlgmr.msra.gmra.mxu1 %vm53_vm4, %v26_v46  ;;  %v240_v46 = vld [vmem:[%s1680_s2] sm:$0xff] }
 0x6e9   :  { %811 = vrot.lane.b32.xlu1 %v809_v56, %s1048_s9  ;;  %813 = vrot.lane.b32.xlu0 %v810_v58, %s1048_s9 }
 0x6f1   :  { %829 = vperm.xlu1 %1017, %v821_v59  }
 0x6f9   :  { %251 = vperm.xlu1 %1017, %v241_v33  }
 0x717   :  { %v326_v12 = vpop.xlane.xlu2 %325 }
 0x718   :  { %v1441_v13 = vsub.f32 %v323_v50, %v326_v12  ;;  %v119_v50 = vshrl.u32 %v115_v22, 7 }
 0x71a   :  { %v120_v53 = vadd.s32 8, %v119_v50  ;;  %v121_v54 = vmul.u32 16, %v119_v50  ;;  %v919_v50 = vld [vmem:[%s1681_s5 + $0x10] sm:$0xff] }
 0x71c   :  { %v122_v59 = vmul.u32 16, %v120_v53  ;;  %v779_v53 = vld [vmem:[%s1680_s2 + $0x10] sm:$0xff] }
 0x71e   :  { %vm125_vm14 = vcmp.ge.s32.totalorder %v1148_v24, %v122_v59 }
 0x723   :  { %327 = vmin.xlane.f32.xlu1 %v324_v60 }
 0x72b   :  { %593 = vmin.xlane.f32.xlu1 %v1426_v51 }
 0x75b   :  { %v812_v62 = vpop.permute.xlu1 %811  ;;  %v814_v52 = vpop.permute.xlu0 %813 }
 0x75c   :  { %v815_v63 = vsel %vm278_vm8, %v812_v62, %v814_v52  ;;  %v816_v0 = vsel %vm278_vm8, %v814_v52, %v812_v62  ;;  %v117_v62 = vadd.s32 128, %v1148_v24  ;;  %vm123_vm8 = vcmp.ge.s32.totalorder %v1148_v24, %v121_v54 }
 0x75d   :  { %v817_v1 = vadd.f32 %v816_v0, %v809_v56  ;;  %v818_v2 = vadd.f32 %v815_v63, %v810_v58  ;;  %v27_v56 = vld [vmem:[%s1679_s4 + $0x8] sm:$0xff] }
 0x75e   :  { %950 = vmatmul.msk.f32.vlgmr.msra.gmra.mxu2 %vm53_vm4, %v27_v56  ;;  %953 = vmatmul.msk.f32.vlgmr.msra.gmra.mxu3 %vm53_vm4, %v27_v56  ;;  %vm124_vm11 = vcmp.ge.s32.totalorder %v117_v62, %v121_v54  ;;  %vm126_vm2 = vcmp.ge.s32.totalorder %v117_v62, %v122_v59  ;;  %v780_v56 = vld [vmem:[%s1678_s3 + $0x10] sm:$0xff] }
 0x75f   :  { %v819_v35 = vadd.f32 %v818_v2, %v817_v1 }
 0x761   :  { %v832_v3 = vperm.slane %v819_v35, 0  ;;  %v128_v35 = vadd.s32 16, %v122_v59 }
 0x763   :  { %v830_v7 = vpop.permute.xlu1 %829  ;;  %v1433_v8 = vmul.f32 %v832_v3, %v825_v4  ;;  %vm131_vm15 = vcmp.lt.s32.totalorder %v1148_v24, %v128_v35  ;;  %vm132_vm3 = vcmp.lt.s32.totalorder %v117_v62, %v128_v35 }
 0x764   :  { %v1435_v55 = vmul.f32 %v832_v3, %v830_v7 }
 0x765   :  { %v835_v9 = vadd.f32 %v1433_v8, %v1433_v8 }
 0x767   :  { %v836_v10 = vadd.f32 %v835_v9, %v1435_v55  ;;  %v28_v9 = vld [vmem:[%s1679_s4 + $0x10] sm:$0xff] }
 0x768   :  { %951 = vmatmul.msk.f32.gmra.mxu2 %vm53_vm4, %v28_v9  ;;  %954 = vmatmul.msk.f32.gmra.mxu3 %vm53_vm4, %v28_v9 }
 0x769   :  { %v837_v11 = vadd.f32 %v836_v10, %v1435_v55 }
 0x76b   :  { %838 = vadd.xlane.f32.xlu0 %v837_v11  ;;  %v1444_v14 = vpop.permute.xlu1 %251 }
 0x773   :  { %331 = vmax.xlane.f32.xlu0 %v1441_v13 }
 0x796   :  { %v328_v15 = vpop.xlane.xlu1 %327 }
 0x797   :  { %v1446_v16 = vsub.f32 %v324_v60, %v328_v15  ;;  %v127_v60 = vadd.s32 16, %v121_v54  ;;  %v652_v54 = vld [vmem:[%s1682_s6 + $0x8] sm:$0xff] }
 0x799   :  { %333 = vmax.xlane.f32.xlu0 %v1446_v16  ;;  %vm129_vm9 = vcmp.lt.s32.totalorder %v1148_v24, %v127_v60  ;;  %vm130_vm12 = vcmp.lt.s32.totalorder %v117_v62, %v127_v60 }
 0x79a   :  { %vm1513_vm0 = vmand %vm123_vm8, %vm129_vm9 }
 0x79b   :  { %vm1527_vm8 = vmand %vm126_vm2, %vm132_vm3 }
 0x79e   :  { %v594_v27 = vpop.xlane.xlu1 %593 }
 0x79f   :  { %v1546_v43 = vsub.f32 %v1426_v51, %v594_v27  ;;  %v512_v51 = vld [vmem:[%s1678_s3 + $0x8] sm:$0xff] }
 0x7a1   :  { %595 = vmin.xlane.f32.xlu0 %v1451_v17 }
 0x7de   :  { %v839_v20 = vpop.xlane.xlu0 %838 }
 0x7df   :  { %v840_v23 = vrot.slane %v839_v20, 4 }
 0x7e1   :  { %v841_v25 = vadd.f32 %v840_v23, %v839_v20 }
 0x7e3   :  { %v842_v26 = vrot.slane %v841_v25, 2 }
 0x7e5   :  { %v843_v49 = vadd.f32 %v842_v26, %v841_v25 }
 0x7e6   :  { %v332_v32 = vpop.xlane.xlu0 %331 }
 0x7e7   :  { %v844_v28 = vrot.slane %v843_v49, 1  ;;  %1031 = vrcp.f32 %v332_v32  ;;  %v346_v33 = vand.u32 2147483648, %v332_v32  ;;  %vm340_vm6 = vweird.f32 %v332_v32 }
 0x7e8   :  { %v344_v22 = vand.u32 2147483647, %v332_v32 }
 0x7e9   :  { %v845_v6 = vadd.f32 %v844_v28, %v843_v49  ;;  %v347_v3 = vor.u32 1.1754944e-38, %v346_v33 }
 0x7ea   :  { %vm345_vm10 = vcmp.eq.f32.partialorder %v344_v22, 8.507059e+37 }
 0x7eb   :  { %1007 = vpush %v845_v6 }
 0x7ed   :  { %v1032_v47 = vpop.eup %1031 }
 0x7ee   :  { %v336_v36 = vmul.f32 %v1032_v47, %v332_v32  ;;  %vm341_vm5 = vweird.f32 %v1032_v47 }
 0x7ef   :  { %vm1490_vm7 = vmor %vm340_vm6, %vm341_vm5 }
 0x7f0   :  { %v337_v37 = vsub.f32 1.0, %v336_v36  ;;  %vm1518_vm5 = vmand %vm124_vm11, %vm130_vm12  ;;  %v384_v36 = vld [vmem:[%s1682_s6] sm:$0xff] }
 0x7f2   :  { %v338_v40 = vmul.f32 %v1032_v47, %v337_v37  ;;  %v511_v37 = vld [vmem:[%s1680_s2 + $0x8] sm:$0xff] }
 0x7f4   :  { %v339_v58 = vadd.f32 %v1032_v47, %v338_v40 }
 0x7f6   :  { %v343_v1 = vsel %vm1490_vm7, %v1032_v47, %v339_v58  ;;  %vm1523_vm7 = vmand %vm125_vm14, %vm131_vm15  ;;  %v385_v47 = vstv %s1125_s19  ;;  %v920_v58 = vld [vmem:[%s1682_s6 + $0x10] sm:$0xff] }
 0x7f7   :  { %v348_v10 = vsel %vm345_vm10, %v347_v3, %v343_v1 }
 0x7f8   :  { %v349_v23 = vmul.f32 %v348_v10, %v1441_v13  ;;  %v106_v10 = vpop.f32.mrf.mxu1 }
 0x7fa   :  { %v365_v13 = vsel %vm1513_vm0, %v349_v23, 0.0  ;;  %v366_v45 = vsel %vm1518_vm5, %v349_v23, 0.0 }
 0x80c   :  { %v334_v39 = vpop.xlane.xlu0 %333 }
 0x80d   :  { %1033 = vrcp.f32 %v334_v39  ;;  %v361_v7 = vand.u32 2147483648, %v334_v39  ;;  %v359_v12 = vand.u32 2147483647, %v334_v39  ;;  %vm355_vm1 = vweird.f32 %v334_v39 }
 0x80f   :  { %v362_v25 = vor.u32 1.1754944e-38, %v361_v7  ;;  %vm360_vm6 = vcmp.eq.f32.partialorder %v359_v12, 8.507059e+37  ;;  %v80_v7 = vpop.f32.mrf.mxu0 }
 0x813   :  { %v1034_v61 = vpop.eup %1033 }
 0x814   :  { %v351_v63 = vmul.f32 %v1034_v61, %v334_v39  ;;  %v596_v0 = vpop.xlane.xlu0 %595  ;;  %vm356_vm13 = vweird.f32 %v1034_v61  ;;  %v921_v39 = vstv %s1373_s16 }
 0x815   :  { %v1497_v2 = vsub.f32 %v1451_v17, %v596_v0  ;;  %vm357_vm4 = vmor %vm355_vm1, %vm356_vm13  ;;  %v922_v40 = vmul.f32 %v921_v39, %v919_v50 }
 0x816   :  { %v352_v4 = vsub.f32 1.0, %v351_v63 }
 0x817   :  { %601 = vmax.xlane.f32.xlu2 %v1497_v2 }
 0x818   :  { %v353_v11 = vmul.f32 %v1034_v61, %v352_v4 }
 0x81a   :  { %v354_v17 = vadd.f32 %v1034_v61, %v353_v11 }
 0x81c   :  { %v358_v26 = vsel %vm357_vm4, %v1034_v61, %v354_v17  ;;  %s1008_s4 = spop %1007 }
 0x81d   :  { %v363_v49 = vsel %vm360_vm6, %v362_v25, %v358_v26  ;;  %s855_s9 = smul.f32 %s1008_s4, %s1259_s12 }
 0x81e   :  { %v364_v6 = vmul.f32 %v363_v49, %v1446_v16 }
 0x81f   :  { %v856_v44 = vstv %s855_s9 }
 0x820   :  { %v367_v57 = vsel %vm1523_vm7, %v364_v6, 0.0  ;;  %v368_v5 = vsel %vm1527_vm8, %v364_v6, 0.0  ;;  %vm857_vm9 = vcmp.gt.f32.partialorder %v1433_v8, %v856_v44  ;;  %vm858_vm10 = vcmp.gt.f32.partialorder %v1435_v55, %v856_v44 }
 0x821   :  { %v369_v16 = vadd.f32 %v367_v57, %v365_v13  ;;  %v376_v32 = vadd.f32 %v368_v5, %v366_v45  ;;  %v859_v38 = vsel %vm857_vm9, %v1433_v8, 0.0  ;;  %v860_v48 = vsel %vm858_vm10, %v1435_v55, 0.0  ;;  %v383_v8 = vld [vmem:[%s1681_s5] sm:$0xff] }
 0x822   :  { %861 = vmin.xlane.f32.xlu1 %v859_v38  ;;  %863 = vmin.xlane.f32.xlu0 %v860_v48  ;;  %v386_v55 = vmul.f32 %v385_v47, %v383_v8 }
 0x823   :  { %v370_v0 = vrot.slane %v369_v16, 4  ;;  %v377_v1 = vrot.slane %v376_v32, 4 }
 0x82a   :  { %599 = vmax.xlane.f32.xlu0 %v1546_v43 }
 0x82f   :  { %244 = vperm.xlu2 %1016, %v240_v46  }
 0x837   :  { %389 = vperm.xlu2 %1016, %v386_v55  }
 0x83b   :  { %400 = vperm.xlu1 %1017, %v384_v36  }
 0x83f   :  { %522 = vperm.xlu2 %1016, %v512_v51  }
 0x843   :  { %515 = vperm.xlu1 %1017, %v511_v37  }
 0x84b   :  { %925 = vperm.xlu1 %1017, %v922_v40  }
 0x853   :  { %783 = vperm.xlu1 %1017, %v779_v53  }
 0x85b   :  { %668 = vperm.xlu1 %1017, %v652_v54  }
 0x863   :  { %790 = vperm.xlu1 %1017, %v780_v56  }
 0x86b   :  { %936 = vperm.xlu1 %1017, %v920_v58  }
 0x88a   :  { %v1581_v59 = vpop.xlane.xlu2 %601 }
 0x88b   :  { %vm623_vm15 = vweird.f32 %v1581_v59 }
 0x892   :  { %v245_v33 = vpop.permute.xlu2 %244 }
 0x893   :  { %v247_v60 = vmul.f32 %v245_v33, %v1137_v19  ;;  %v248_v61 = vmul.f32 %v245_v33, %v1143_v21  ;;  %v371_v19 = vadd.f32 %v370_v0, %v369_v16  ;;  %v378_v21 = vadd.f32 %v377_v1, %v376_v32 }
 0x895   :  { %v254_v22 = vadd.f32 %v1444_v14, %v247_v60  ;;  %v255_v62 = vadd.f32 %v1444_v14, %v248_v61  ;;  %v862_v52 = vpop.xlane.xlu1 %861  ;;  %v864_v35 = vpop.xlane.xlu0 %863  ;;  %v372_v14 = vrot.slane %v371_v19, 2  ;;  %v379_v4 = vrot.slane %v378_v21, 2 }
 0x896   :  { %v1590_v63 = vsub.f32 %v859_v38, %v862_v52  ;;  %v1596_v3 = vsub.f32 %v860_v48, %v864_v35  ;;  %v651_v38 = vld [vmem:[%s1681_s5 + $0x8] sm:$0xff]  ;;  %v653_v48 = vstv %s1262_s14 }
 0x897   :  { %405 = vst [vmem:[%s1683_s7] sm:$0xff] %v254_v22  ;;  %v373_v11 = vadd.f32 %v372_v14, %v371_v19  ;;  %v380_v12 = vadd.f32 %v379_v4, %v378_v21  ;;  %v629_v19 = vand.u32 2147483648, %v1581_v59  ;;  %v627_v21 = vand.u32 2147483647, %v1581_v59 }
 0x898   :  { %406 = vst [vmem:[%s1683_s7 + $0x8] sm:$0xff] %v255_v62  ;;  %867 = vmax.xlane.f32.xlu0 %v1590_v63 }
 0x899   :  { %v374_v25 = vrot.slane %v373_v11, 1  ;;  %v381_v26 = vrot.slane %v380_v12, 1  ;;  %vm628_vm3 = vcmp.eq.f32.partialorder %v627_v21, 8.507059e+37 }
 0x89a   :  { %v390_v9 = vpop.permute.xlu2 %389 }
 0x89b   :  { %v392_v17 = vsub.f32 %v80_v7, %v390_v9  ;;  %v393_v23 = vsub.f32 %v106_v10, %v390_v9  ;;  %v375_v13 = vadd.f32 %v374_v25, %v373_v11  ;;  %v382_v44 = vadd.f32 %v381_v26, %v380_v12 }
 0x89c   :  { %v630_v7 = vor.u32 1.1754944e-38, %v629_v19 }
 0x89d   :  { %v394_v49 = vmul.f32 %v392_v17, %v1134_v18  ;;  %v395_v6 = vmul.f32 %v393_v23, %v1134_v18  ;;  %v654_v18 = vmul.f32 %v653_v48, %v651_v38  ;;  %v600_v54 = vpop.xlane.xlu0 %599 }
 0x89e   :  { %1035 = vrcp.f32 %v600_v54  ;;  %v614_v52 = vand.u32 2147483648, %v600_v54  ;;  %vm608_vm13 = vweird.f32 %v600_v54  ;;  %v612_v1 = vand.u32 2147483647, %v600_v54 }
 0x89f   :  { %v396_v45 = vmul.f32 %v394_v49, %v375_v13  ;;  %v397_v57 = vmul.f32 %v395_v6, %v382_v44  ;;  %1037 = vrcp.f32 %v1581_v59 }
 0x8a0   :  { %869 = vmax.xlane.f32.xlu0 %v1596_v3  ;;  %v615_v14 = vor.u32 1.1754944e-38, %v614_v52  ;;  %vm613_vm2 = vcmp.eq.f32.partialorder %v612_v1, 8.507059e+37 }
 0x8a2   :  { %v523_v47 = vpop.permute.xlu2 %522 }
 0x8a4   :  { %v1036_v56 = vpop.eup %1035 }
 0x8a5   :  { %v1038_v58 = vpop.eup %1037  ;;  %vm609_vm11 = vweird.f32 %v1036_v56 }
 0x8a6   :  { %vm624_vm12 = vweird.f32 %v1038_v58  ;;  %vm610_vm14 = vmor %vm608_vm13, %vm609_vm11 }
 0x8a7   :  { %vm625_vm1 = vmor %vm623_vm15, %vm624_vm12 }
 0x8ad   :  { %v401_v5 = vpop.permute.xlu1 %400 }
 0x8ae   :  { %v403_v16 = vadd.f32 %v401_v5, %v396_v45  ;;  %v404_v32 = vadd.f32 %v401_v5, %v397_v57 }
 0x8b0   :  { %407 = vst [vmem:[%s1683_s7 + $0x10] sm:$0xff] %v403_v16 }
 0x8b1   :  { %408 = vst [vmem:[%s1683_s7 + $0x18] sm:$0xff] %v404_v32 }
 0x8b4   :  { %657 = vperm.xlu0 %1018, %v654_v18  }
 0x8b5   :  { %v516_v27 = vpop.permute.xlu1 %515 }
 0x8b6   :  { %v518_v46 = vmul.f32 %v516_v27, %v1276_v31  ;;  %v519_v8 = vmul.f32 %v516_v27, %v1273_v30 }
 0x8b8   :  { %v525_v55 = vadd.f32 %v523_v47, %v518_v46  ;;  %v526_v36 = vadd.f32 %v523_v47, %v519_v8 }
 0x8ba   :  { %673 = vst [vmem:[%s1683_s7 + $0x20] sm:$0xff] %v525_v55 }
 0x8bb   :  { %674 = vst [vmem:[%s1683_s7 + $0x28] sm:$0xff] %v526_v36 }
 0x8bd   :  { %v1619_v51 = vpop.permute.xlu1 %925 }
 0x8c5   :  { %v784_v37 = vpop.permute.xlu1 %783 }
 0x8c6   :  { %v786_v31 = vmul.f32 %v784_v37, %v1387_v42  ;;  %v787_v30 = vmul.f32 %v784_v37, %v1384_v34  ;;  %v604_v42 = vmul.f32 %v1036_v56, %v600_v54  ;;  %v619_v34 = vmul.f32 %v1038_v58, %v1581_v59 }
 0x8c8   :  { %v605_v33 = vsub.f32 1.0, %v604_v42  ;;  %v620_v60 = vsub.f32 1.0, %v619_v34  ;;  %v83_v34 = vpop.f32.mrf.mxu2 }
 0x8ca   :  { %v606_v61 = vmul.f32 %v1036_v56, %v605_v33  ;;  %v621_v22 = vmul.f32 %v1038_v58, %v620_v60  ;;  %v109_v33 = vpop.f32.mrf.mxu3 }
 0x8cc   :  { %v607_v62 = vadd.f32 %v1036_v56, %v606_v61  ;;  %v622_v0 = vadd.f32 %v1038_v58, %v621_v22 }
 0x8cd   :  { %v1621_v50 = vpop.permute.xlu1 %668 }
 0x8ce   :  { %v611_v35 = vsel %vm610_vm14, %v1036_v56, %v607_v62  ;;  %v626_v4 = vsel %vm625_vm1, %v1038_v58, %v622_v0 }
 0x8cf   :  { %v616_v9 = vsel %vm613_vm2, %v615_v14, %v611_v35  ;;  %v631_v10 = vsel %vm628_vm3, %v630_v7, %v626_v4 }
 0x8d0   :  { %v617_v11 = vmul.f32 %v616_v9, %v1546_v43  ;;  %v632_v17 = vmul.f32 %v631_v10, %v1497_v2 }
 0x8d2   :  { %v633_v23 = vsel %vm1513_vm0, %v617_v11, 0.0  ;;  %v634_v59 = vsel %vm1518_vm5, %v617_v11, 0.0  ;;  %v635_v25 = vsel %vm1523_vm7, %v632_v17, 0.0  ;;  %v636_v26 = vsel %vm1527_vm8, %v632_v17, 0.0 }
 0x8d3   :  { %v637_v49 = vadd.f32 %v635_v25, %v633_v23  ;;  %v644_v6 = vadd.f32 %v636_v26, %v634_v59  ;;  %v86_v59 = vpop.f32.mrf.mxu2  ;;  %v112_v25 = vpop.f32.mrf.mxu3 }
 0x8d5   :  { %v791_v39 = vpop.permute.xlu1 %790  ;;  %v638_v45 = vrot.slane %v637_v49, 4  ;;  %v645_v57 = vrot.slane %v644_v6, 4 }
 0x8d6   :  { %v793_v40 = vadd.f32 %v791_v39, %v786_v31  ;;  %v794_v53 = vadd.f32 %v791_v39, %v787_v30 }
 0x8d7   :  { %v639_v38 = vadd.f32 %v638_v45, %v637_v49  ;;  %v646_v48 = vadd.f32 %v645_v57, %v644_v6 }
 0x8d8   :  { %941 = vst [vmem:[%s1683_s7 + $0x40] sm:$0xff] %v793_v40 }
 0x8d9   :  { %942 = vst [vmem:[%s1683_s7 + $0x48] sm:$0xff] %v794_v53  ;;  %v640_v36 = vrot.slane %v639_v38, 2  ;;  %v647_v37 = vrot.slane %v646_v48, 2 }
 0x8db   :  { %v641_v54 = vadd.f32 %v640_v36, %v639_v38  ;;  %v648_v56 = vadd.f32 %v647_v37, %v646_v48 }
 0x8dd   :  { %v642_v62 = vrot.slane %v641_v54, 1  ;;  %v649_v52 = vrot.slane %v648_v56, 1  ;;  %v937_v48 = vpop.permute.xlu1 %936 }
 0x8df   :  { %v650_v9 = vadd.f32 %v649_v52, %v648_v56 }
 0x90b   :  { %v868_v12 = vpop.xlane.xlu0 %867 }
 0x90c   :  { %1039 = vrcp.f32 %v868_v12  ;;  %v882_v32 = vand.u32 2147483648, %v868_v12  ;;  %vm876_vm6 = vweird.f32 %v868_v12  ;;  %v880_v27 = vand.u32 2147483647, %v868_v12 }
 0x90e   :  { %v883_v47 = vor.u32 1.1754944e-38, %v882_v32  ;;  %vm881_vm10 = vcmp.eq.f32.partialorder %v880_v27, 8.507059e+37 }
 0x912   :  { %v1040_v13 = vpop.eup %1039 }
 0x913   :  { %v872_v43 = vmul.f32 %v1040_v13, %v868_v12  ;;  %v870_v44 = vpop.xlane.xlu0 %869  ;;  %vm877_vm4 = vweird.f32 %v1040_v13 }
 0x914   :  { %1041 = vrcp.f32 %v870_v44  ;;  %vm878_vm9 = vmor %vm876_vm6, %vm877_vm4  ;;  %v897_v31 = vand.u32 2147483648, %v870_v44  ;;  %v895_v40 = vand.u32 2147483647, %v870_v44  ;;  %vm891_vm12 = vweird.f32 %v870_v44 }
 0x915   :  { %v873_v2 = vsub.f32 1.0, %v872_v43 }
 0x916   :  { %v898_v42 = vor.u32 1.1754944e-38, %v897_v31  ;;  %vm896_vm14 = vcmp.eq.f32.partialorder %v895_v40, 8.507059e+37 }
 0x917   :  { %v874_v5 = vmul.f32 %v1040_v13, %v873_v2 }
 0x919   :  { %v875_v16 = vadd.f32 %v1040_v13, %v874_v5 }
 0x91a   :  { %v1042_v18 = vpop.eup %1041 }
 0x91b   :  { %v887_v46 = vmul.f32 %v1042_v18, %v870_v44  ;;  %v879_v8 = vsel %vm878_vm9, %v1040_v13, %v875_v16  ;;  %vm892_vm11 = vweird.f32 %v1042_v18  ;;  %v929_v13 = vsub.f32 %v112_v25, %v1619_v51 }
 0x91c   :  { %v884_v30 = vsel %vm881_vm10, %v883_v47, %v879_v8  ;;  %vm893_vm13 = vmor %vm891_vm12, %vm892_vm11 }
 0x91d   :  { %v888_v55 = vsub.f32 1.0, %v887_v46  ;;  %v885_v58 = vmul.f32 %v884_v30, %v1590_v63  ;;  %v931_v57 = vmul.f32 %v929_v13, %v1381_v41 }
 0x91f   :  { %v889_v39 = vmul.f32 %v1042_v18, %v888_v55  ;;  %v901_v0 = vsel %vm1513_vm0, %v885_v58, 0.0  ;;  %v902_v1 = vsel %vm1518_vm5, %v885_v58, 0.0 }
 0x921   :  { %v890_v53 = vadd.f32 %v1042_v18, %v889_v39 }
 0x923   :  { %v894_v60 = vsel %vm893_vm13, %v1042_v18, %v890_v53 }
 0x924   :  { %v899_v61 = vsel %vm896_vm14, %v898_v42, %v894_v60 }
 0x925   :  { %v900_v22 = vmul.f32 %v899_v61, %v1596_v3  ;;  %v643_v3 = vadd.f32 %v642_v62, %v641_v54 }
 0x926   :  { %v658_v19 = vpop.permute.xlu0 %657 }
 0x927   :  { %v903_v63 = vsel %vm1523_vm7, %v900_v22, 0.0  ;;  %v904_v21 = vsel %vm1527_vm8, %v900_v22, 0.0  ;;  %v660_v35 = vsub.f32 %v83_v34, %v658_v19  ;;  %v661_v14 = vsub.f32 %v109_v33, %v658_v19 }
 0x928   :  { %v905_v4 = vadd.f32 %v903_v63, %v901_v0  ;;  %v912_v7 = vadd.f32 %v904_v21, %v902_v1 }
 0x929   :  { %v662_v10 = vmul.f32 %v660_v35, %v1270_v29  ;;  %v663_v15 = vmul.f32 %v661_v14, %v1270_v29  ;;  %v928_v29 = vsub.f32 %v86_v59, %v1619_v51 }
 0x92a   :  { %v906_v11 = vrot.slane %v905_v4, 4  ;;  %v913_v20 = vrot.slane %v912_v7, 4 }
 0x92b   :  { %v664_v12 = vmul.f32 %v662_v10, %v643_v3  ;;  %v665_v17 = vmul.f32 %v663_v15, %v650_v9 }
 0x92c   :  { %v907_v23 = vadd.f32 %v906_v11, %v905_v4  ;;  %v914_v24 = vadd.f32 %v913_v20, %v912_v7 }
 0x92d   :  { %v671_v28 = vadd.f32 %v1621_v50, %v664_v12  ;;  %v672_v26 = vadd.f32 %v1621_v50, %v665_v17  ;;  %v930_v50 = vmul.f32 %v928_v29, %v1381_v41 }
 0x92e   :  { %v908_v49 = vrot.slane %v907_v23, 2  ;;  %v915_v6 = vrot.slane %v914_v24, 2 }
 0x92f   :  { %675 = vst [vmem:[%s1683_s7 + $0x30] sm:$0xff] %v671_v28 }
 0x930   :  { %v909_v43 = vadd.f32 %v908_v49, %v907_v23  ;;  %v916_v44 = vadd.f32 %v915_v6, %v914_v24  ;;  %676 = vst [vmem:[%s1683_s7 + $0x38] sm:$0xff] %v672_v26 }
 0x932   :  { %v910_v2 = vrot.slane %v909_v43, 1  ;;  %v917_v45 = vrot.slane %v916_v44, 1 }
 0x934   :  { %v911_v5 = vadd.f32 %v910_v2, %v909_v43  ;;  %v918_v16 = vadd.f32 %v917_v45, %v916_v44 }
 0x936   :  { %v932_v32 = vmul.f32 %v930_v50, %v911_v5  ;;  %v933_v38 = vmul.f32 %v931_v57, %v918_v16 }
 0x938   :  { %v939_v18 = vadd.f32 %v937_v48, %v932_v32  ;;  %v940_v27 = vadd.f32 %v937_v48, %v933_v38 }
 0x93a   :  { %943 = vst [vmem:[%s1683_s7 + $0x50] sm:$0xff] %v939_v18 }
 0x93b   :  { %944 = vst [vmem:[%s1683_s7 + $0x58] sm:$0xff] %v940_v27 }

</bundles_post_ra>
